<compile_context>
chip_gen: v7x
topology: tpu7x:2x2x1
jax: 0.10.0
libtpu: 0.0.40
codegen_flags: <defaults>
</compile_context>

<pallas_src>
import functools

import jax
import jax.numpy as jnp
from jax.experimental import pallas as pl
from jax.experimental.pallas import tpu as pltpu

LN_EPS = 1e-5                      # GPT2 layer_norm_epsilon
VMEM_LIMIT = 48 * 1024 * 1024      # explicit budget with headroom for v7x (64 MiB/TC)


# ------------------------------ helpers ------------------------------------ #

def _gelu_new(x):
    # GPT-2 "gelu_new": 0.5*x*(1 + tanh(sqrt(2/pi)*(x + 0.044715*x^3)))
    c = jnp.float32(0.7978845608028654)
    return 0.5 * x * (1.0 + jnp.tanh(c * (x + 0.044715 * (x * x * x))))


def _tile(dim, target, align):
    """Largest tile <= target that is a multiple of `align` and divides dim,
    else the full extent (always legal)."""
    if dim <= target:
        return dim
    t = (target // align) * align
    while t >= align:
        if dim % t == 0:
            return t
        t -= align
    return dim


# ----------------------------- Pallas kernels ------------------------------ #

def _matmul_kernel(x_ref, w_ref, b_ref, o_ref, acc_ref, *, activation):
    # Tiled matmul with K-axis reduction: acc init on k==0, finalize on last k.
    @pl.when(pl.program_id(2) == 0)
    def _():
        acc_ref[...] = jnp.zeros_like(acc_ref)

    acc_ref[...] += jnp.dot(x_ref[...].astype(jnp.bfloat16), w_ref[...],
                            preferred_element_type=jnp.float32)

    @pl.when(pl.program_id(2) == pl.num_programs(2) - 1)
    def _():
        y = acc_ref[...] + b_ref[...]
        if activation == "gelu_new":
            y = _gelu_new(y)
        o_ref[...] = y


def _matmul_res_kernel(x_ref, w_ref, b_ref, res_ref, o_ref, acc_ref):
    # Same as above but fuses bias + residual add on the last k step.
    @pl.when(pl.program_id(2) == 0)
    def _():
        acc_ref[...] = jnp.zeros_like(acc_ref)

    acc_ref[...] += jnp.dot(x_ref[...].astype(jnp.bfloat16), w_ref[...],
                            preferred_element_type=jnp.float32)

    @pl.when(pl.program_id(2) == pl.num_programs(2) - 1)
    def _():
        o_ref[...] = acc_ref[...] + b_ref[...] + res_ref[...]


def _ln_matmul_kernel(x_ref, g_ref, bln_ref, w_ref, b_ref, o_ref, *, activation):
    # Fused LayerNorm (full feature dim, f32) + matmul (bf16 MXU, f32 acc).
    x = x_ref[...]
    mu = jnp.mean(x, axis=-1, keepdims=True)
    var = jnp.mean(jnp.square(x - mu), axis=-1, keepdims=True)
    xn = (x - mu) * jax.lax.rsqrt(var + LN_EPS) * g_ref[...] + bln_ref[...]
    y = jnp.dot(xn.astype(jnp.bfloat16), w_ref[...],
                preferred_element_type=jnp.float32) + b_ref[...]
    if activation == "gelu_new":
        y = _gelu_new(y)
    o_ref[...] = y


def _attn_kernel(q_ref, k_ref, v_ref, o_ref, *, scale):
    # One batch element per grid step; all heads batched: refs are (1, H, S, Dh).
    q = q_ref[0].astype(jnp.bfloat16)
    k = k_ref[0].astype(jnp.bfloat16)
    v = v_ref[0].astype(jnp.bfloat16)
    # (H,S,Dh) x (H,S,Dh) -> (H,S,S): contract last dims, batch over heads (no .T).
    s = jax.lax.dot_general(q, k, (((2,), (2,)), ((0,), (0,))),
                            preferred_element_type=jnp.float32) * scale
    seq = q.shape[1]
    row = jax.lax.broadcasted_iota(jnp.int32, (seq, seq), 0)
    col = jax.lax.broadcasted_iota(jnp.int32, (seq, seq), 1)
    s = jnp.where((row >= col)[None, :, :], s, -1e30)      # causal mask
    s = s - jnp.max(s, axis=-1, keepdims=True)
    p = jnp.exp(s)
    p = p / jnp.sum(p, axis=-1, keepdims=True)
    # (H,S,S) x (H,S,Dh) -> (H,S,Dh)
    o_ref[0] = jax.lax.dot_general(p.astype(jnp.bfloat16), v,
                                   (((2,), (1,)), ((0,), (0,))),
                                   preferred_element_type=jnp.float32)


# ----------------------------- Pallas wrappers ----------------------------- #

def pallas_matmul(x, w, b, *, residual=None, activation=None,
                  tm=256, tn=256, tk=512):
    """Tiled y = act(x @ w + b) [+ residual], f32 accumulation, bf16 MXU inputs."""
    m, kdim = x.shape
    n = w.shape[1]
    tm = _tile(m, tm, 8)
    tn = _tile(n, tn, 128)
    tk = _tile(kdim, tk, 128)
    gm, gn, gk = m // tm, n // tn, kdim // tk
    b2 = b.reshape(1, n)

    x_spec = pl.BlockSpec((tm, tk), lambda i, j, kk: (i, kk))
    w_spec = pl.BlockSpec((tk, tn), lambda i, j, kk: (kk, j))
    b_spec = pl.BlockSpec((1, tn), lambda i, j, kk: (0, j))
    o_spec = pl.BlockSpec((tm, tn), lambda i, j, kk: (i, j))

    if residual is None:
        kernel = functools.partial(_matmul_kernel, activation=activation)
        in_specs = [x_spec, w_spec, b_spec]
        args = (x, w, b2)
    else:
        kernel = _matmul_res_kernel
        in_specs = [x_spec, w_spec, b_spec,
                    pl.BlockSpec((tm, tn), lambda i, j, kk: (i, j))]
        args = (x, w, b2, residual)

    return pl.pallas_call(
        kernel,
        out_shape=jax.ShapeDtypeStruct((m, n), jnp.float32),
        grid=(gm, gn, gk),
        in_specs=in_specs,
        out_specs=o_spec,
        scratch_shapes=[pltpu.VMEM((tm, tn), jnp.float32)],
        compiler_params=pltpu.CompilerParams(
            dimension_semantics=("parallel", "parallel", "arbitrary"),
            vmem_limit_bytes=VMEM_LIMIT),
    )(*args)


def pallas_ln_matmul(x, g, bln, w, b, *, activation=None, tm=256, tn=256):
    """Fused LayerNorm(x) @ w + b [+ gelu_new]. K kept full (LN needs full features)."""
    m, kdim = x.shape
    n = w.shape[1]
    tm = _tile(m, tm, 8)
    tn = _tile(n, tn, 128)
    gm, gn = m // tm, n // tn
    return pl.pallas_call(
        functools.partial(_ln_matmul_kernel, activation=activation),
        out_shape=jax.ShapeDtypeStruct((m, n), jnp.float32),
        grid=(gm, gn),
        in_specs=[
            pl.BlockSpec((tm, kdim), lambda i, j: (i, 0)),
            pl.BlockSpec((1, kdim), lambda i, j: (0, 0)),
            pl.BlockSpec((1, kdim), lambda i, j: (0, 0)),
            pl.BlockSpec((kdim, tn), lambda i, j: (0, j)),
            pl.BlockSpec((1, tn), lambda i, j: (0, j)),
        ],
        out_specs=pl.BlockSpec((tm, tn), lambda i, j: (i, j)),
        compiler_params=pltpu.CompilerParams(
            dimension_semantics=("parallel", "parallel"),
            vmem_limit_bytes=VMEM_LIMIT),
    )(x, g.reshape(1, kdim), bln.reshape(1, kdim), w, b.reshape(1, n))


def pallas_causal_attention(q, k, v):
    """q, k, v: (B', H, S, Dh) f32.  All heads batched per grid step; grid parallel."""
    bp, h, s, dh = q.shape
    scale = 1.0 / (dh ** 0.5)
    spec = pl.BlockSpec((1, h, s, dh), lambda i: (i, 0, 0, 0))
    return pl.pallas_call(
        functools.partial(_attn_kernel, scale=scale),
        out_shape=jax.ShapeDtypeStruct((bp, h, s, dh), jnp.float32),
        grid=(bp,),
        in_specs=[spec, spec, spec],
        out_specs=spec,
        compiler_params=pltpu.CompilerParams(
            dimension_semantics=("parallel",),
            vmem_limit_bytes=VMEM_LIMIT),
    )(q, k, v)


# ------------------------------- Parameters -------------------------------- #

def init_params(key, n_arms, n_dims, n_embd, n_layer, max_input_len):
    def normal_bf16(k, shape, std=0.02):
        return (std * jax.random.normal(k, shape, dtype=jnp.float32)).astype(jnp.bfloat16)

    keys = iter(jax.random.split(key, 4 + 4 * n_layer))

    # Fused, lane-padded policy/value head: [policy_w | value_w | zeros] -> (d, 128k)
    head_n = ((n_arms + 1 + 127) // 128) * 128
    policy_w = normal_bf16(next(keys), (n_embd, n_arms))
    value_w = normal_bf16(next(keys), (n_embd, 1))
    head_w = jnp.zeros((n_embd, head_n), jnp.bfloat16)
    head_w = head_w.at[:, :n_arms].set(policy_w).at[:, n_arms:n_arms + 1].set(value_w)

    params = {
        "read_in_w": normal_bf16(next(keys), (n_dims, n_embd)),
        "read_in_b": jnp.zeros((n_embd,), jnp.float32),
        "wpe": (0.02 * jax.random.normal(next(keys), (max_input_len, n_embd))
                ).astype(jnp.float32),
        "lnf_g": jnp.ones((n_embd,), jnp.float32),
        "lnf_b": jnp.zeros((n_embd,), jnp.float32),
        "head_w": head_w,
        "head_b": jnp.zeros((head_n,), jnp.float32),
        "layers": [],
    }
    for _ in range(n_layer):
        layer = {
            "ln1_g": jnp.ones((n_embd,), jnp.float32),
            "ln1_b": jnp.zeros((n_embd,), jnp.float32),
            "attn_w": normal_bf16(next(keys), (n_embd, 3 * n_embd)),
            "attn_b": jnp.zeros((3 * n_embd,), jnp.float32),
            "proj_w": normal_bf16(next(keys), (n_embd, n_embd)),
            "proj_b": jnp.zeros((n_embd,), jnp.float32),
            "ln2_g": jnp.ones((n_embd,), jnp.float32),
            "ln2_b": jnp.zeros((n_embd,), jnp.float32),
            "fc_w": normal_bf16(next(keys), (n_embd, 4 * n_embd)),
            "fc_b": jnp.zeros((4 * n_embd,), jnp.float32),
            "mlp_proj_w": normal_bf16(next(keys), (4 * n_embd, n_embd)),
            "mlp_proj_b": jnp.zeros((n_embd,), jnp.float32),
        }
        params["layers"].append(layer)
    return params


# ------------------------------ Forward pass -------------------------------- #

def combine(actions, rewards):
    # torch.stack((a, r), axis=2).squeeze(3).view(b, s, 2*d)
    b, s, d = actions.shape
    together = jnp.stack((actions.astype(jnp.float32),
                          rewards.astype(jnp.float32)), axis=2)
    return together.reshape(b, s, 2 * d)


def gpt2_backbone(params, embeds, n_head):
    bp, s, d = embeds.shape
    dh = d // n_head
    x = (embeds + params["wpe"][:s][None, :, :]).reshape(bp * s, d)

    for layer in params["layers"]:
        # --- attention block: fused LN1 + QKV projection ---
        qkv = pallas_ln_matmul(x, layer["ln1_g"], layer["ln1_b"],
                               layer["attn_w"], layer["attn_b"])
        # TODO(synk): fold head split/merge into the QKV / proj kernels via out_specs
        # once head_dim is lane-aligned; at Dh=8 these stay as thin XLA reshapes.
        qkv = qkv.reshape(bp, s, 3, n_head, dh).transpose(2, 0, 3, 1, 4)
        o = pallas_causal_attention(qkv[0], qkv[1], qkv[2])       # (bp, H, s, dh)
        o = o.transpose(0, 2, 1, 3).reshape(bp * s, d)
        # fused attention output projection + residual add
        x = pallas_matmul(o, layer["proj_w"], layer["proj_b"], residual=x)
        # --- MLP block: fused LN2 + FC + GeLU, then fused proj + residual ---
        h = pallas_ln_matmul(x, layer["ln2_g"], layer["ln2_b"],
                             layer["fc_w"], layer["fc_b"], activation="gelu_new")
        x = pallas_matmul(h, layer["mlp_proj_w"], layer["mlp_proj_b"], residual=x)
    return x   # (bp*s, d), pre final-LN (final LN fused into the head projection)


def forward(params, actions, rewards, *, n_arms, n_head, symmetric=True):
    bsize, seq_len, _ = actions.shape

    if symmetric:
        all_actions = jnp.concatenate(
            [(actions + sh) % n_arms for sh in range(n_arms)], axis=0)
        all_rewards = jnp.concatenate([rewards] * n_arms, axis=0)
    else:
        all_actions, all_rewards = actions, rewards

    zs = combine(all_actions, all_rewards)                       # (B', S, 2*dim)
    bp, s, feat = zs.shape
    embeds = pallas_matmul(zs.reshape(bp * s, feat),
                           params["read_in_w"], params["read_in_b"])
    embeds = embeds.reshape(bp, s, -1)

    x = gpt2_backbone(params, embeds, n_head)                    # (bp*s, d)

    # Final LN + fused (lane-padded) policy/value head in one kernel.
    heads = pallas_ln_matmul(x, params["lnf_g"], params["lnf_b"],
                             params["head_w"], params["head_b"])
    heads = heads.reshape(bp, s, -1)
    all_policy = heads[..., :n_arms]
    all_value = heads[..., n_arms:n_arms + 1]

    if not symmetric:
        return {"policy": all_policy, "value": all_value, "past_key_values": None}

    # Cyclic-shift symmetrisation epilogue (tiny tensors — plain JAX).
    policy = all_policy.reshape(n_arms, bsize, s, n_arms)
    value = all_value.reshape(n_arms, bsize, s, 1)
    rolled = jnp.stack([jnp.roll(policy[sh], shift=-sh, axis=-1)
                        for sh in range(n_arms)], axis=0)
    return {
        "policy": jnp.mean(rolled, axis=0),
        "value": jnp.mean(value, axis=0),
        "past_key_values": None,
    }


# --------------------------------- Driver ----------------------------------- #

if __name__ == "__main__":
    n_arms, n_dims, n_embd, n_layer, n_head = 4, 2, 32, 2, 4
    max_input_len = 128
    batch, seq = 2, 8

    key = jax.random.PRNGKey(0)
    kp, ka, kr = jax.random.split(key, 3)

    params = init_params(kp, n_arms, n_dims, n_embd, n_layer, max_input_len)
    actions = jax.random.randint(ka, (batch, seq, 1), 0, n_arms, dtype=jnp.int32)
    rewards = jax.random.bernoulli(kr, 0.5, (batch, seq, 1)).astype(jnp.float32)

    fwd = jax.jit(functools.partial(forward, n_arms=n_arms, n_head=n_head,
                                    symmetric=True))
    out = fwd(params, actions, rewards)
    jax.block_until_ready(out)

    assert out["policy"].shape == (batch, seq, n_arms)
    assert out["value"].shape == (batch, seq, 1)
    print("KERNEL_OK")
</pallas_src>

<mosaic_0001>
module attributes {stable_mosaic.version = 11 : i64} {
  func.func @_matmul_kernel(%arg0: i32, %arg1: i32, %arg2: i32, %arg3: memref<64x2xf32, #tpu.memory_space<vmem>>, %arg4: memref<2x32xbf16, #tpu.memory_space<vmem>>, %arg5: memref<1x32xf32, #tpu.memory_space<vmem>>, %arg6: memref<64x32xf32, #tpu.memory_space<vmem>>, %arg7: memref<64x32xf32, #tpu.memory_space<vmem>>) attributes {dimension_semantics = [#tpu.dimension_semantics<parallel>, #tpu.dimension_semantics<parallel>, #tpu.dimension_semantics<arbitrary>], iteration_bounds = array<i64: 1, 1, 1>, scalar_prefetch = 0 : i64, scratch_operands = 1 : i64, tpu.core_type = #tpu.core_type<tc>, window_params = [{transform_indices = @transform_0, window_bounds = array<i64: 64, 2>}, {transform_indices = @transform_1, window_bounds = array<i64: 2, 32>}, {transform_indices = @transform_2, window_bounds = array<i64: 1, 32>}, {transform_indices = @transform_3, window_bounds = array<i64: 64, 32>}]} {
    %c0_i32 = arith.constant 0 : i32
    %0 = arith.cmpi eq, %arg2, %c0_i32 : i32
    %1 = arith.extui %0 : i1 to i32
    %c0_i32_0 = arith.constant 0 : i32
    %2 = arith.cmpi ne, %1, %c0_i32_0 : i32
    scf.if %2 {
      %cst_10 = arith.constant 0.000000e+00 : f32
      %13 = vector.broadcast %cst_10 : f32 to vector<64x32xf32>
      %c0_11 = arith.constant 0 : index
      %c0_12 = arith.constant 0 : index
      %14 = vector.load %arg7[%c0_11, %c0_12] : memref<64x32xf32, #tpu.memory_space<vmem>>, vector<64x32xf32>
      tpu.vector_store %arg7[%c0_11, %c0_12], %13 {strides = array<i32>} : memref<64x32xf32, #tpu.memory_space<vmem>>, vector<64x32xf32>,
    } else {
    }
    %c0 = arith.constant 0 : index
    %c0_1 = arith.constant 0 : index
    %3 = vector.load %arg7[%c0, %c0_1] : memref<64x32xf32, #tpu.memory_space<vmem>>, vector<64x32xf32>
    %c0_2 = arith.constant 0 : index
    %c0_3 = arith.constant 0 : index
    %4 = vector.load %arg3[%c0_2, %c0_3] : memref<64x2xf32, #tpu.memory_space<vmem>>, vector<64x2xf32>
    %5 = arith.truncf %4 : vector<64x2xf32> to vector<64x2xbf16>
    %c0_4 = arith.constant 0 : index
    %c0_5 = arith.constant 0 : index
    %6 = vector.load %arg4[%c0_4, %c0_5] : memref<2x32xbf16, #tpu.memory_space<vmem>>, vector<2x32xbf16>
    %cst = arith.constant dense<0.000000e+00> : vector<64x32xf32>
    %7 = tpu.matmul %5, %6, %cst {dimension_numbers = #tpu.dot_dimension_numbers<[1], [0], [0], [1], [0, 0, 1, 1], [], []>} : vector<64x2xbf16>, vector<2x32xbf16>, vector<64x32xf32> -> vector<64x32xf32>
    %8 = arith.addf %3, %7 : vector<64x32xf32>
    %c0_6 = arith.constant 0 : index
    %c0_7 = arith.constant 0 : index
    %9 = vector.load %arg7[%c0_6, %c0_7] : memref<64x32xf32, #tpu.memory_space<vmem>>, vector<64x32xf32>
    tpu.vector_store %arg7[%c0_6, %c0_7], %8 {strides = array<i32>} : memref<64x32xf32, #tpu.memory_space<vmem>>, vector<64x32xf32>,
    %c0_i32_8 = arith.constant 0 : i32
    %10 = arith.cmpi eq, %arg2, %c0_i32_8 : i32
    %11 = arith.extui %10 : i1 to i32
    %c0_i32_9 = arith.constant 0 : i32
    %12 = arith.cmpi ne, %11, %c0_i32_9 : i32
    scf.if %12 {
      %c0_10 = arith.constant 0 : index
      %c0_11 = arith.constant 0 : index
      %13 = vector.load %arg7[%c0_10, %c0_11] : memref<64x32xf32, #tpu.memory_space<vmem>>, vector<64x32xf32>
      %c0_12 = arith.constant 0 : index
      %c0_13 = arith.constant 0 : index
      %14 = vector.load %arg5[%c0_12, %c0_13] : memref<1x32xf32, #tpu.memory_space<vmem>>, vector<1x32xf32>
      %15 = vector.broadcast %14 : vector<1x32xf32> to vector<64x32xf32>
      %16 = arith.addf %13, %15 : vector<64x32xf32>
      %c0_14 = arith.constant 0 : index
      %c0_15 = arith.constant 0 : index
      %17 = vector.load %arg6[%c0_14, %c0_15] : memref<64x32xf32, #tpu.memory_space<vmem>>, vector<64x32xf32>
      tpu.vector_store %arg6[%c0_14, %c0_15], %16 {strides = array<i32>} : memref<64x32xf32, #tpu.memory_space<vmem>>, vector<64x32xf32>,
    } else {
    }
    return
  }
  func.func @transform_0(%arg0: i32, %arg1: i32, %arg2: i32) -> (i32, i32) {
    %c0_i32 = arith.constant 0 : i32
    return %arg0, %arg2 : i32, i32
  }
  func.func @transform_1(%arg0: i32, %arg1: i32, %arg2: i32) -> (i32, i32) {
    %c0_i32 = arith.constant 0 : i32
    return %arg2, %arg1 : i32, i32
  }
  func.func @transform_2(%arg0: i32, %arg1: i32, %arg2: i32) -> (i32, i32) {
    %c0_i32 = arith.constant 0 : i32
    %c0_i32_0 = arith.constant 0 : i32
    return %c0_i32, %arg1 : i32, i32
  }
  func.func @transform_3(%arg0: i32, %arg1: i32, %arg2: i32) -> (i32, i32) {
    %c0_i32 = arith.constant 0 : i32
    return %arg0, %arg1 : i32, i32
  }
}

module attributes {stable_mosaic.version = 11 : i64} {
  func.func @_ln_matmul_kernel(%arg0: i32, %arg1: i32, %arg2: memref<64x32xf32, #tpu.memory_space<vmem>>, %arg3: memref<1x32xf32, #tpu.memory_space<vmem>>, %arg4: memref<1x32xf32, #tpu.memory_space<vmem>>, %arg5: memref<32x96xbf16, #tpu.memory_space<vmem>>, %arg6: memref<1x96xf32, #tpu.memory_space<vmem>>, %arg7: memref<64x96xf32, #tpu.memory_space<vmem>>) attributes {dimension_semantics = [#tpu.dimension_semantics<parallel>, #tpu.dimension_semantics<parallel>], iteration_bounds = array<i64: 1, 1>, scalar_prefetch = 0 : i64, scratch_operands = 0 : i64, tpu.core_type = #tpu.core_type<tc>, window_params = [{transform_indices = @transform_0, window_bounds = array<i64: 64, 32>}, {pipeline_mode = #tpu.pipeline_mode<synchronous>, transform_indices = @transform_1, window_bounds = array<i64: 1, 32>}, {pipeline_mode = #tpu.pipeline_mode<synchronous>, transform_indices = @transform_2, window_bounds = array<i64: 1, 32>}, {transform_indices = @transform_3, window_bounds = array<i64: 32, 96>}, {transform_indices = @transform_4, window_bounds = array<i64: 1, 96>}, {transform_indices = @transform_5, window_bounds = array<i64: 64, 96>}]} {
    %c0 = arith.constant 0 : index
    %c0_0 = arith.constant 0 : index
    %0 = vector.load %arg2[%c0, %c0_0] : memref<64x32xf32, #tpu.memory_space<vmem>>, vector<64x32xf32>
    %cst = arith.constant dense<0.000000e+00> : vector<64xf32>
    %1 = vector.multi_reduction <add>, %0, %cst [1] : vector<64x32xf32> to vector<64xf32>
    %2 = vector.shape_cast %1 : vector<64xf32> to vector<64x1xf32>
    %cst_1 = arith.constant 3.200000e+01 : f32
    %3 = vector.broadcast %cst_1 : f32 to vector<64x1xf32>
    %4 = arith.divf %2, %3 : vector<64x1xf32>
    %5 = vector.broadcast %4 : vector<64x1xf32> to vector<64x32xf32>
    %6 = arith.subf %0, %5 : vector<64x32xf32>
    %7 = arith.mulf %6, %6 : vector<64x32xf32>
    %cst_2 = arith.constant dense<0.000000e+00> : vector<64xf32>
    %8 = vector.multi_reduction <add>, %7, %cst_2 [1] : vector<64x32xf32> to vector<64xf32>
    %9 = vector.shape_cast %8 : vector<64xf32> to vector<64x1xf32>
    %cst_3 = arith.constant 3.200000e+01 : f32
    %10 = vector.broadcast %cst_3 : f32 to vector<64x1xf32>
    %11 = arith.divf %9, %10 : vector<64x1xf32>
    %12 = vector.broadcast %4 : vector<64x1xf32> to vector<64x32xf32>
    %13 = arith.subf %0, %12 : vector<64x32xf32>
    %cst_4 = arith.constant 9.99999974E-6 : f32
    %14 = vector.broadcast %cst_4 : f32 to vector<64x1xf32>
    %15 = arith.addf %11, %14 : vector<64x1xf32>
    %16 = math.rsqrt %15 : vector<64x1xf32>
    %17 = vector.broadcast %16 : vector<64x1xf32> to vector<64x32xf32>
    %18 = arith.mulf %13, %17 : vector<64x32xf32>
    %c0_5 = arith.constant 0 : index
    %c0_6 = arith.constant 0 : index
    %19 = vector.load %arg3[%c0_5, %c0_6] : memref<1x32xf32, #tpu.memory_space<vmem>>, vector<1x32xf32>
    %20 = vector.broadcast %19 : vector<1x32xf32> to vector<64x32xf32>
    %21 = arith.mulf %18, %20 : vector<64x32xf32>
    %c0_7 = arith.constant 0 : index
    %c0_8 = arith.constant 0 : index
    %22 = vector.load %arg4[%c0_7, %c0_8] : memref<1x32xf32, #tpu.memory_space<vmem>>, vector<1x32xf32>
    %23 = vector.broadcast %22 : vector<1x32xf32> to vector<64x32xf32>
    %24 = arith.addf %21, %23 : vector<64x32xf32>
    %25 = arith.truncf %24 : vector<64x32xf32> to vector<64x32xbf16>
    %c0_9 = arith.constant 0 : index
    %c0_10 = arith.constant 0 : index
    %26 = vector.load %arg5[%c0_9, %c0_10] : memref<32x96xbf16, #tpu.memory_space<vmem>>, vector<32x96xbf16>
    %cst_11 = arith.constant dense<0.000000e+00> : vector<64x96xf32>
    %27 = tpu.matmul %25, %26, %cst_11 {dimension_numbers = #tpu.dot_dimension_numbers<[1], [0], [0], [1], [0, 0, 1, 1], [], []>} : vector<64x32xbf16>, vector<32x96xbf16>, vector<64x96xf32> -> vector<64x96xf32>
    %c0_12 = arith.constant 0 : index
    %c0_13 = arith.constant 0 : index
    %28 = vector.load %arg6[%c0_12, %c0_13] : memref<1x96xf32, #tpu.memory_space<vmem>>, vector<1x96xf32>
    %29 = vector.broadcast %28 : vector<1x96xf32> to vector<64x96xf32>
    %30 = arith.addf %27, %29 : vector<64x96xf32>
    %c0_14 = arith.constant 0 : index
    %c0_15 = arith.constant 0 : index
    %31 = vector.load %arg7[%c0_14, %c0_15] : memref<64x96xf32, #tpu.memory_space<vmem>>, vector<64x96xf32>
    tpu.vector_store %arg7[%c0_14, %c0_15], %30 {strides = array<i32>} : memref<64x96xf32, #tpu.memory_space<vmem>>, vector<64x96xf32>,
    return
  }
  func.func @transform_0(%arg0: i32, %arg1: i32) -> (i32, i32) {
    %c0_i32 = arith.constant 0 : i32
    %c0_i32_0 = arith.constant 0 : i32
    return %arg0, %c0_i32 : i32, i32
  }
  func.func @transform_1(%arg0: i32, %arg1: i32) -> (i32, i32) {
    %c0_i32 = arith.constant 0 : i32
    %c0_i32_0 = arith.constant 0 : i32
    %c0_i32_1 = arith.constant 0 : i32
    return %c0_i32, %c0_i32_0 : i32, i32
  }
  func.func @transform_2(%arg0: i32, %arg1: i32) -> (i32, i32) {
    %c0_i32 = arith.constant 0 : i32
    %c0_i32_0 = arith.constant 0 : i32
    %c0_i32_1 = arith.constant 0 : i32
    return %c0_i32, %c0_i32_0 : i32, i32
  }
  func.func @transform_3(%arg0: i32, %arg1: i32) -> (i32, i32) {
    %c0_i32 = arith.constant 0 : i32
    %c0_i32_0 = arith.constant 0 : i32
    return %c0_i32, %arg1 : i32, i32
  }
  func.func @transform_4(%arg0: i32, %arg1: i32) -> (i32, i32) {
    %c0_i32 = arith.constant 0 : i32
    %c0_i32_0 = arith.constant 0 : i32
    return %c0_i32, %arg1 : i32, i32
  }
  func.func @transform_5(%arg0: i32, %arg1: i32) -> (i32, i32) {
    %c0_i32 = arith.constant 0 : i32
    return %arg0, %arg1 : i32, i32
  }
}

module attributes {stable_mosaic.version = 11 : i64} {
  func.func @_attn_kernel(%arg0: i32, %arg1: memref<1x4x8x8xf32, #tpu.memory_space<vmem>>, %arg2: memref<1x4x8x8xf32, #tpu.memory_space<vmem>>, %arg3: memref<1x4x8x8xf32, #tpu.memory_space<vmem>>, %arg4: memref<1x4x8x8xf32, #tpu.memory_space<vmem>>) attributes {dimension_semantics = [#tpu.dimension_semantics<parallel>], iteration_bounds = array<i64: 8>, scalar_prefetch = 0 : i64, scratch_operands = 0 : i64, tpu.core_type = #tpu.core_type<tc>, window_params = [{transform_indices = @transform_0, window_bounds = array<i64: 1, 4, 8, 8>}, {transform_indices = @transform_1, window_bounds = array<i64: 1, 4, 8, 8>}, {transform_indices = @transform_2, window_bounds = array<i64: 1, 4, 8, 8>}, {transform_indices = @transform_3, window_bounds = array<i64: 1, 4, 8, 8>}]} {
    %c0 = arith.constant 0 : index
    %c0_0 = arith.constant 0 : index
    %c0_1 = arith.constant 0 : index
    %c0_2 = arith.constant 0 : index
    %0 = vector.load %arg1[%c0, %c0_0, %c0_1, %c0_2] : memref<1x4x8x8xf32, #tpu.memory_space<vmem>>, vector<1x4x8x8xf32>
    %1 = vector.shape_cast %0 : vector<1x4x8x8xf32> to vector<4x8x8xf32>
    %2 = arith.truncf %1 : vector<4x8x8xf32> to vector<4x8x8xbf16>
    %c0_3 = arith.constant 0 : index
    %c0_4 = arith.constant 0 : index
    %c0_5 = arith.constant 0 : index
    %c0_6 = arith.constant 0 : index
    %3 = vector.load %arg2[%c0_3, %c0_4, %c0_5, %c0_6] : memref<1x4x8x8xf32, #tpu.memory_space<vmem>>, vector<1x4x8x8xf32>
    %4 = vector.shape_cast %3 : vector<1x4x8x8xf32> to vector<4x8x8xf32>
    %5 = arith.truncf %4 : vector<4x8x8xf32> to vector<4x8x8xbf16>
    %c0_7 = arith.constant 0 : index
    %c0_8 = arith.constant 0 : index
    %c0_9 = arith.constant 0 : index
    %c0_10 = arith.constant 0 : index
    %6 = vector.load %arg3[%c0_7, %c0_8, %c0_9, %c0_10] : memref<1x4x8x8xf32, #tpu.memory_space<vmem>>, vector<1x4x8x8xf32>
    %7 = vector.shape_cast %6 : vector<1x4x8x8xf32> to vector<4x8x8xf32>
    %8 = arith.truncf %7 : vector<4x8x8xf32> to vector<4x8x8xbf16>
    %cst = arith.constant dense<0.000000e+00> : vector<4x8x8xf32>
    %9 = tpu.matmul %2, %5, %cst {dimension_numbers = #tpu.dot_dimension_numbers<[2], [2], [1], [1], [0, 0, 0, 1, 1, 1], [0], [0]>} : vector<4x8x8xbf16>, vector<4x8x8xbf16>, vector<4x8x8xf32> -> vector<4x8x8xf32>
    %cst_11 = arith.constant 0.353553385 : f32
    %10 = vector.broadcast %cst_11 : f32 to vector<4x8x8xf32>
    %11 = arith.mulf %9, %10 : vector<4x8x8xf32>
    %12 = tpu.iota {dimensions = array<i32: 0>} : vector<8x8xi32>
    %13 = tpu.iota {dimensions = array<i32: 1>} : vector<8x8xi32>
    %14 = arith.cmpi sge, %12, %13 : vector<8x8xi32>
    %15 = vector.shape_cast %14 : vector<8x8xi1> to vector<1x8x8xi1>
    %cst_12 = arith.constant -1.000000e+30 : f32
    %16 = vector.shape_cast %15 : vector<1x8x8xi1> to vector<1x8x8xi1>
    %17 = vector.broadcast %16 : vector<1x8x8xi1> to vector<4x8x8xi1>
    %18 = vector.broadcast %cst_12 : f32 to vector<4x8x8xf32>
    %19 = arith.select %17, %11, %18 : vector<4x8x8xi1>, vector<4x8x8xf32>
    %cst_13 = arith.constant dense<0xFF800000> : vector<4x8xf32>
    %20 = vector.multi_reduction <maximumf>, %19, %cst_13 [2] : vector<4x8x8xf32> to vector<4x8xf32>
    %21 = vector.shape_cast %20 : vector<4x8xf32> to vector<4x8x1xf32>
    %22 = vector.broadcast %21 : vector<4x8x1xf32> to vector<4x8x8xf32>
    %23 = arith.subf %19, %22 : vector<4x8x8xf32>
    %24 = math.exp %23 : vector<4x8x8xf32>
    %cst_14 = arith.constant dense<0.000000e+00> : vector<4x8xf32>
    %25 = vector.multi_reduction <add>, %24, %cst_14 [2] : vector<4x8x8xf32> to vector<4x8xf32>
    %26 = vector.shape_cast %25 : vector<4x8xf32> to vector<4x8x1xf32>
    %27 = vector.broadcast %26 : vector<4x8x1xf32> to vector<4x8x8xf32>
    %28 = arith.divf %24, %27 : vector<4x8x8xf32>
    %29 = arith.truncf %28 : vector<4x8x8xf32> to vector<4x8x8xbf16>
    %cst_15 = arith.constant dense<0.000000e+00> : vector<4x8x8xf32>
    %30 = tpu.matmul %29, %8, %cst_15 {dimension_numbers = #tpu.dot_dimension_numbers<[2], [1], [1], [2], [0, 0, 0, 1, 1, 2], [0], [0]>} : vector<4x8x8xbf16>, vector<4x8x8xbf16>, vector<4x8x8xf32> -> vector<4x8x8xf32>
    %c0_16 = arith.constant 0 : index
    %c0_17 = arith.constant 0 : index
    %c0_18 = arith.constant 0 : index
    %c0_19 = arith.constant 0 : index
    %31 = vector.load %arg4[%c0_16, %c0_17, %c0_18, %c0_19] : memref<1x4x8x8xf32, #tpu.memory_space<vmem>>, vector<1x4x8x8xf32>
    %32 = vector.shape_cast %31 : vector<1x4x8x8xf32> to vector<4x8x8xf32>
    %33 = vector.shape_cast %30 : vector<4x8x8xf32> to vector<1x4x8x8xf32>
    tpu.vector_store %arg4[%c0_16, %c0_17, %c0_18, %c0_19], %33 {strides = array<i32>} : memref<1x4x8x8xf32, #tpu.memory_space<vmem>>, vector<1x4x8x8xf32>,
    return
  }
  func.func @transform_0(%arg0: i32) -> (i32, i32, i32, i32) {
    %c0_i32 = arith.constant 0 : i32
    %c0_i32_0 = arith.constant 0 : i32
    %c0_i32_1 = arith.constant 0 : i32
    %c0_i32_2 = arith.constant 0 : i32
    return %arg0, %c0_i32, %c0_i32_0, %c0_i32_1 : i32, i32, i32, i32
  }
  func.func @transform_1(%arg0: i32) -> (i32, i32, i32, i32) {
    %c0_i32 = arith.constant 0 : i32
    %c0_i32_0 = arith.constant 0 : i32
    %c0_i32_1 = arith.constant 0 : i32
    %c0_i32_2 = arith.constant 0 : i32
    return %arg0, %c0_i32, %c0_i32_0, %c0_i32_1 : i32, i32, i32, i32
  }
  func.func @transform_2(%arg0: i32) -> (i32, i32, i32, i32) {
    %c0_i32 = arith.constant 0 : i32
    %c0_i32_0 = arith.constant 0 : i32
    %c0_i32_1 = arith.constant 0 : i32
    %c0_i32_2 = arith.constant 0 : i32
    return %arg0, %c0_i32, %c0_i32_0, %c0_i32_1 : i32, i32, i32, i32
  }
  func.func @transform_3(%arg0: i32) -> (i32, i32, i32, i32) {
    %c0_i32 = arith.constant 0 : i32
    %c0_i32_0 = arith.constant 0 : i32
    %c0_i32_1 = arith.constant 0 : i32
    %c0_i32_2 = arith.constant 0 : i32
    return %arg0, %c0_i32, %c0_i32_0, %c0_i32_1 : i32, i32, i32, i32
  }
}

module attributes {stable_mosaic.version = 11 : i64} {
  func.func @_matmul_res_kernel(%arg0: i32, %arg1: i32, %arg2: i32, %arg3: memref<64x32xf32, #tpu.memory_space<vmem>>, %arg4: memref<32x32xbf16, #tpu.memory_space<vmem>>, %arg5: memref<1x32xf32, #tpu.memory_space<vmem>>, %arg6: memref<64x32xf32, #tpu.memory_space<vmem>>, %arg7: memref<64x32xf32, #tpu.memory_space<vmem>>, %arg8: memref<64x32xf32, #tpu.memory_space<vmem>>) attributes {dimension_semantics = [#tpu.dimension_semantics<parallel>, #tpu.dimension_semantics<parallel>, #tpu.dimension_semantics<arbitrary>], iteration_bounds = array<i64: 1, 1, 1>, scalar_prefetch = 0 : i64, scratch_operands = 1 : i64, tpu.core_type = #tpu.core_type<tc>, window_params = [{transform_indices = @transform_0, window_bounds = array<i64: 64, 32>}, {transform_indices = @transform_1, window_bounds = array<i64: 32, 32>}, {transform_indices = @transform_2, window_bounds = array<i64: 1, 32>}, {transform_indices = @transform_3, window_bounds = array<i64: 64, 32>}, {transform_indices = @transform_4, window_bounds = array<i64: 64, 32>}]} {
    %c0_i32 = arith.constant 0 : i32
    %0 = arith.cmpi eq, %arg2, %c0_i32 : i32
    %1 = arith.extui %0 : i1 to i32
    %c0_i32_0 = arith.constant 0 : i32
    %2 = arith.cmpi ne, %1, %c0_i32_0 : i32
    scf.if %2 {
      %cst_10 = arith.constant 0.000000e+00 : f32
      %13 = vector.broadcast %cst_10 : f32 to vector<64x32xf32>
      %c0_11 = arith.constant 0 : index
      %c0_12 = arith.constant 0 : index
      %14 = vector.load %arg8[%c0_11, %c0_12] : memref<64x32xf32, #tpu.memory_space<vmem>>, vector<64x32xf32>
      tpu.vector_store %arg8[%c0_11, %c0_12], %13 {strides = array<i32>} : memref<64x32xf32, #tpu.memory_space<vmem>>, vector<64x32xf32>,
    } else {
    }
    %c0 = arith.constant 0 : index
    %c0_1 = arith.constant 0 : index
    %3 = vector.load %arg8[%c0, %c0_1] : memref<64x32xf32, #tpu.memory_space<vmem>>, vector<64x32xf32>
    %c0_2 = arith.constant 0 : index
    %c0_3 = arith.constant 0 : index
    %4 = vector.load %arg3[%c0_2, %c0_3] : memref<64x32xf32, #tpu.memory_space<vmem>>, vector<64x32xf32>
    %5 = arith.truncf %4 : vector<64x32xf32> to vector<64x32xbf16>
    %c0_4 = arith.constant 0 : index
    %c0_5 = arith.constant 0 : index
    %6 = vector.load %arg4[%c0_4, %c0_5] : memref<32x32xbf16, #tpu.memory_space<vmem>>, vector<32x32xbf16>
    %cst = arith.constant dense<0.000000e+00> : vector<64x32xf32>
    %7 = tpu.matmul %5, %6, %cst {dimension_numbers = #tpu.dot_dimension_numbers<[1], [0], [0], [1], [0, 0, 1, 1], [], []>} : vector<64x32xbf16>, vector<32x32xbf16>, vector<64x32xf32> -> vector<64x32xf32>
    %8 = arith.addf %3, %7 : vector<64x32xf32>
    %c0_6 = arith.constant 0 : index
    %c0_7 = arith.constant 0 : index
    %9 = vector.load %arg8[%c0_6, %c0_7] : memref<64x32xf32, #tpu.memory_space<vmem>>, vector<64x32xf32>
    tpu.vector_store %arg8[%c0_6, %c0_7], %8 {strides = array<i32>} : memref<64x32xf32, #tpu.memory_space<vmem>>, vector<64x32xf32>,
    %c0_i32_8 = arith.constant 0 : i32
    %10 = arith.cmpi eq, %arg2, %c0_i32_8 : i32
    %11 = arith.extui %10 : i1 to i32
    %c0_i32_9 = arith.constant 0 : i32
    %12 = arith.cmpi ne, %11, %c0_i32_9 : i32
    scf.if %12 {
      %c0_10 = arith.constant 0 : index
      %c0_11 = arith.constant 0 : index
      %13 = vector.load %arg8[%c0_10, %c0_11] : memref<64x32xf32, #tpu.memory_space<vmem>>, vector<64x32xf32>
      %c0_12 = arith.constant 0 : index
      %c0_13 = arith.constant 0 : index
      %14 = vector.load %arg5[%c0_12, %c0_13] : memref<1x32xf32, #tpu.memory_space<vmem>>, vector<1x32xf32>
      %15 = vector.broadcast %14 : vector<1x32xf32> to vector<64x32xf32>
      %16 = arith.addf %13, %15 : vector<64x32xf32>
      %c0_14 = arith.constant 0 : index
      %c0_15 = arith.constant 0 : index
      %17 = vector.load %arg6[%c0_14, %c0_15] : memref<64x32xf32, #tpu.memory_space<vmem>>, vector<64x32xf32>
      %18 = arith.addf %16, %17 : vector<64x32xf32>
      %c0_16 = arith.constant 0 : index
      %c0_17 = arith.constant 0 : index
      %19 = vector.load %arg7[%c0_16, %c0_17] : memref<64x32xf32, #tpu.memory_space<vmem>>, vector<64x32xf32>
      tpu.vector_store %arg7[%c0_16, %c0_17], %18 {strides = array<i32>} : memref<64x32xf32, #tpu.memory_space<vmem>>, vector<64x32xf32>,
    } else {
    }
    return
  }
  func.func @transform_0(%arg0: i32, %arg1: i32, %arg2: i32) -> (i32, i32) {
    %c0_i32 = arith.constant 0 : i32
    return %arg0, %arg2 : i32, i32
  }
  func.func @transform_1(%arg0: i32, %arg1: i32, %arg2: i32) -> (i32, i32) {
    %c0_i32 = arith.constant 0 : i32
    return %arg2, %arg1 : i32, i32
  }
  func.func @transform_2(%arg0: i32, %arg1: i32, %arg2: i32) -> (i32, i32) {
    %c0_i32 = arith.constant 0 : i32
    %c0_i32_0 = arith.constant 0 : i32
    return %c0_i32, %arg1 : i32, i32
  }
  func.func @transform_3(%arg0: i32, %arg1: i32, %arg2: i32) -> (i32, i32) {
    %c0_i32 = arith.constant 0 : i32
    return %arg0, %arg1 : i32, i32
  }
  func.func @transform_4(%arg0: i32, %arg1: i32, %arg2: i32) -> (i32, i32) {
    %c0_i32 = arith.constant 0 : i32
    return %arg0, %arg1 : i32, i32
  }
}

module attributes {stable_mosaic.version = 11 : i64} {
  func.func @_matmul_res_kernel(%arg0: i32, %arg1: i32, %arg2: i32, %arg3: memref<64x128xf32, #tpu.memory_space<vmem>>, %arg4: memref<128x32xbf16, #tpu.memory_space<vmem>>, %arg5: memref<1x32xf32, #tpu.memory_space<vmem>>, %arg6: memref<64x32xf32, #tpu.memory_space<vmem>>, %arg7: memref<64x32xf32, #tpu.memory_space<vmem>>, %arg8: memref<64x32xf32, #tpu.memory_space<vmem>>) attributes {dimension_semantics = [#tpu.dimension_semantics<parallel>, #tpu.dimension_semantics<parallel>, #tpu.dimension_semantics<arbitrary>], iteration_bounds = array<i64: 1, 1, 1>, scalar_prefetch = 0 : i64, scratch_operands = 1 : i64, tpu.core_type = #tpu.core_type<tc>, window_params = [{transform_indices = @transform_0, window_bounds = array<i64: 64, 128>}, {transform_indices = @transform_1, window_bounds = array<i64: 128, 32>}, {transform_indices = @transform_2, window_bounds = array<i64: 1, 32>}, {transform_indices = @transform_3, window_bounds = array<i64: 64, 32>}, {transform_indices = @transform_4, window_bounds = array<i64: 64, 32>}]} {
    %c0_i32 = arith.constant 0 : i32
    %0 = arith.cmpi eq, %arg2, %c0_i32 : i32
    %1 = arith.extui %0 : i1 to i32
    %c0_i32_0 = arith.constant 0 : i32
    %2 = arith.cmpi ne, %1, %c0_i32_0 : i32
    scf.if %2 {
      %cst_10 = arith.constant 0.000000e+00 : f32
      %13 = vector.broadcast %cst_10 : f32 to vector<64x32xf32>
      %c0_11 = arith.constant 0 : index
      %c0_12 = arith.constant 0 : index
      %14 = vector.load %arg8[%c0_11, %c0_12] : memref<64x32xf32, #tpu.memory_space<vmem>>, vector<64x32xf32>
      tpu.vector_store %arg8[%c0_11, %c0_12], %13 {strides = array<i32>} : memref<64x32xf32, #tpu.memory_space<vmem>>, vector<64x32xf32>,
    } else {
    }
    %c0 = arith.constant 0 : index
    %c0_1 = arith.constant 0 : index
    %3 = vector.load %arg8[%c0, %c0_1] : memref<64x32xf32, #tpu.memory_space<vmem>>, vector<64x32xf32>
    %c0_2 = arith.constant 0 : index
    %c0_3 = arith.constant 0 : index
    %4 = vector.load %arg3[%c0_2, %c0_3] : memref<64x128xf32, #tpu.memory_space<vmem>>, vector<64x128xf32>
    %5 = arith.truncf %4 : vector<64x128xf32> to vector<64x128xbf16>
    %c0_4 = arith.constant 0 : index
    %c0_5 = arith.constant 0 : index
    %6 = vector.load %arg4[%c0_4, %c0_5] : memref<128x32xbf16, #tpu.memory_space<vmem>>, vector<128x32xbf16>
    %cst = arith.constant dense<0.000000e+00> : vector<64x32xf32>
    %7 = tpu.matmul %5, %6, %cst {dimension_numbers = #tpu.dot_dimension_numbers<[1], [0], [0], [1], [0, 0, 1, 1], [], []>} : vector<64x128xbf16>, vector<128x32xbf16>, vector<64x32xf32> -> vector<64x32xf32>
    %8 = arith.addf %3, %7 : vector<64x32xf32>
    %c0_6 = arith.constant 0 : index
    %c0_7 = arith.constant 0 : index
    %9 = vector.load %arg8[%c0_6, %c0_7] : memref<64x32xf32, #tpu.memory_space<vmem>>, vector<64x32xf32>
    tpu.vector_store %arg8[%c0_6, %c0_7], %8 {strides = array<i32>} : memref<64x32xf32, #tpu.memory_space<vmem>>, vector<64x32xf32>,
    %c0_i32_8 = arith.constant 0 : i32
    %10 = arith.cmpi eq, %arg2, %c0_i32_8 : i32
    %11 = arith.extui %10 : i1 to i32
    %c0_i32_9 = arith.constant 0 : i32
    %12 = arith.cmpi ne, %11, %c0_i32_9 : i32
    scf.if %12 {
      %c0_10 = arith.constant 0 : index
      %c0_11 = arith.constant 0 : index
      %13 = vector.load %arg8[%c0_10, %c0_11] : memref<64x32xf32, #tpu.memory_space<vmem>>, vector<64x32xf32>
      %c0_12 = arith.constant 0 : index
      %c0_13 = arith.constant 0 : index
      %14 = vector.load %arg5[%c0_12, %c0_13] : memref<1x32xf32, #tpu.memory_space<vmem>>, vector<1x32xf32>
      %15 = vector.broadcast %14 : vector<1x32xf32> to vector<64x32xf32>
      %16 = arith.addf %13, %15 : vector<64x32xf32>
      %c0_14 = arith.constant 0 : index
      %c0_15 = arith.constant 0 : index
      %17 = vector.load %arg6[%c0_14, %c0_15] : memref<64x32xf32, #tpu.memory_space<vmem>>, vector<64x32xf32>
      %18 = arith.addf %16, %17 : vector<64x32xf32>
      %c0_16 = arith.constant 0 : index
      %c0_17 = arith.constant 0 : index
      %19 = vector.load %arg7[%c0_16, %c0_17] : memref<64x32xf32, #tpu.memory_space<vmem>>, vector<64x32xf32>
      tpu.vector_store %arg7[%c0_16, %c0_17], %18 {strides = array<i32>} : memref<64x32xf32, #tpu.memory_space<vmem>>, vector<64x32xf32>,
    } else {
    }
    return
  }
  func.func @transform_0(%arg0: i32, %arg1: i32, %arg2: i32) -> (i32, i32) {
    %c0_i32 = arith.constant 0 : i32
    return %arg0, %arg2 : i32, i32
  }
  func.func @transform_1(%arg0: i32, %arg1: i32, %arg2: i32) -> (i32, i32) {
    %c0_i32 = arith.constant 0 : i32
    return %arg2, %arg1 : i32, i32
  }
  func.func @transform_2(%arg0: i32, %arg1: i32, %arg2: i32) -> (i32, i32) {
    %c0_i32 = arith.constant 0 : i32
    %c0_i32_0 = arith.constant 0 : i32
    return %c0_i32, %arg1 : i32, i32
  }
  func.func @transform_3(%arg0: i32, %arg1: i32, %arg2: i32) -> (i32, i32) {
    %c0_i32 = arith.constant 0 : i32
    return %arg0, %arg1 : i32, i32
  }
  func.func @transform_4(%arg0: i32, %arg1: i32, %arg2: i32) -> (i32, i32) {
    %c0_i32 = arith.constant 0 : i32
    return %arg0, %arg1 : i32, i32
  }
}

module attributes {stable_mosaic.version = 11 : i64} {
  func.func @_ln_matmul_kernel(%arg0: i32, %arg1: i32, %arg2: memref<64x32xf32, #tpu.memory_space<vmem>>, %arg3: memref<1x32xf32, #tpu.memory_space<vmem>>, %arg4: memref<1x32xf32, #tpu.memory_space<vmem>>, %arg5: memref<32x128xbf16, #tpu.memory_space<vmem>>, %arg6: memref<1x128xf32, #tpu.memory_space<vmem>>, %arg7: memref<64x128xf32, #tpu.memory_space<vmem>>) attributes {dimension_semantics = [#tpu.dimension_semantics<parallel>, #tpu.dimension_semantics<parallel>], iteration_bounds = array<i64: 1, 1>, scalar_prefetch = 0 : i64, scratch_operands = 0 : i64, tpu.core_type = #tpu.core_type<tc>, window_params = [{transform_indices = @transform_0, window_bounds = array<i64: 64, 32>}, {pipeline_mode = #tpu.pipeline_mode<synchronous>, transform_indices = @transform_1, window_bounds = array<i64: 1, 32>}, {pipeline_mode = #tpu.pipeline_mode<synchronous>, transform_indices = @transform_2, window_bounds = array<i64: 1, 32>}, {transform_indices = @transform_3, window_bounds = array<i64: 32, 128>}, {transform_indices = @transform_4, window_bounds = array<i64: 1, 128>}, {transform_indices = @transform_5, window_bounds = array<i64: 64, 128>}]} {
    %c0 = arith.constant 0 : index
    %c0_0 = arith.constant 0 : index
    %0 = vector.load %arg2[%c0, %c0_0] : memref<64x32xf32, #tpu.memory_space<vmem>>, vector<64x32xf32>
    %cst = arith.constant dense<0.000000e+00> : vector<64xf32>
    %1 = vector.multi_reduction <add>, %0, %cst [1] : vector<64x32xf32> to vector<64xf32>
    %2 = vector.shape_cast %1 : vector<64xf32> to vector<64x1xf32>
    %cst_1 = arith.constant 3.200000e+01 : f32
    %3 = vector.broadcast %cst_1 : f32 to vector<64x1xf32>
    %4 = arith.divf %2, %3 : vector<64x1xf32>
    %5 = vector.broadcast %4 : vector<64x1xf32> to vector<64x32xf32>
    %6 = arith.subf %0, %5 : vector<64x32xf32>
    %7 = arith.mulf %6, %6 : vector<64x32xf32>
    %cst_2 = arith.constant dense<0.000000e+00> : vector<64xf32>
    %8 = vector.multi_reduction <add>, %7, %cst_2 [1] : vector<64x32xf32> to vector<64xf32>
    %9 = vector.shape_cast %8 : vector<64xf32> to vector<64x1xf32>
    %cst_3 = arith.constant 3.200000e+01 : f32
    %10 = vector.broadcast %cst_3 : f32 to vector<64x1xf32>
    %11 = arith.divf %9, %10 : vector<64x1xf32>
    %12 = vector.broadcast %4 : vector<64x1xf32> to vector<64x32xf32>
    %13 = arith.subf %0, %12 : vector<64x32xf32>
    %cst_4 = arith.constant 9.99999974E-6 : f32
    %14 = vector.broadcast %cst_4 : f32 to vector<64x1xf32>
    %15 = arith.addf %11, %14 : vector<64x1xf32>
    %16 = math.rsqrt %15 : vector<64x1xf32>
    %17 = vector.broadcast %16 : vector<64x1xf32> to vector<64x32xf32>
    %18 = arith.mulf %13, %17 : vector<64x32xf32>
    %c0_5 = arith.constant 0 : index
    %c0_6 = arith.constant 0 : index
    %19 = vector.load %arg3[%c0_5, %c0_6] : memref<1x32xf32, #tpu.memory_space<vmem>>, vector<1x32xf32>
    %20 = vector.broadcast %19 : vector<1x32xf32> to vector<64x32xf32>
    %21 = arith.mulf %18, %20 : vector<64x32xf32>
    %c0_7 = arith.constant 0 : index
    %c0_8 = arith.constant 0 : index
    %22 = vector.load %arg4[%c0_7, %c0_8] : memref<1x32xf32, #tpu.memory_space<vmem>>, vector<1x32xf32>
    %23 = vector.broadcast %22 : vector<1x32xf32> to vector<64x32xf32>
    %24 = arith.addf %21, %23 : vector<64x32xf32>
    %25 = arith.truncf %24 : vector<64x32xf32> to vector<64x32xbf16>
    %c0_9 = arith.constant 0 : index
    %c0_10 = arith.constant 0 : index
    %26 = vector.load %arg5[%c0_9, %c0_10] : memref<32x128xbf16, #tpu.memory_space<vmem>>, vector<32x128xbf16>
    %cst_11 = arith.constant dense<0.000000e+00> : vector<64x128xf32>
    %27 = tpu.matmul %25, %26, %cst_11 {dimension_numbers = #tpu.dot_dimension_numbers<[1], [0], [0], [1], [0, 0, 1, 1], [], []>} : vector<64x32xbf16>, vector<32x128xbf16>, vector<64x128xf32> -> vector<64x128xf32>
    %c0_12 = arith.constant 0 : index
    %c0_13 = arith.constant 0 : index
    %28 = vector.load %arg6[%c0_12, %c0_13] : memref<1x128xf32, #tpu.memory_space<vmem>>, vector<1x128xf32>
    %29 = vector.broadcast %28 : vector<1x128xf32> to vector<64x128xf32>
    %30 = arith.addf %27, %29 : vector<64x128xf32>
    %cst_14 = arith.constant 5.000000e-01 : f32
    %31 = vector.broadcast %cst_14 : f32 to vector<64x128xf32>
    %32 = arith.mulf %31, %30 : vector<64x128xf32>
    %33 = arith.mulf %30, %30 : vector<64x128xf32>
    %34 = arith.mulf %33, %30 : vector<64x128xf32>
    %cst_15 = arith.constant 4.471500e-02 : f32
    %35 = vector.broadcast %cst_15 : f32 to vector<64x128xf32>
    %36 = arith.mulf %35, %34 : vector<64x128xf32>
    %37 = arith.addf %30, %36 : vector<64x128xf32>
    %cst_16 = arith.constant 0.797884583 : f32
    %38 = vector.broadcast %cst_16 : f32 to vector<64x128xf32>
    %39 = arith.mulf %38, %37 : vector<64x128xf32>
    %40 = math.tanh %39 : vector<64x128xf32>
    %cst_17 = arith.constant 1.000000e+00 : f32
    %41 = vector.broadcast %cst_17 : f32 to vector<64x128xf32>
    %42 = arith.addf %41, %40 : vector<64x128xf32>
    %43 = arith.mulf %32, %42 : vector<64x128xf32>
    %c0_18 = arith.constant 0 : index
    %c0_19 = arith.constant 0 : index
    %44 = vector.load %arg7[%c0_18, %c0_19] : memref<64x128xf32, #tpu.memory_space<vmem>>, vector<64x128xf32>
    tpu.vector_store %arg7[%c0_18, %c0_19], %43 {strides = array<i32>} : memref<64x128xf32, #tpu.memory_space<vmem>>, vector<64x128xf32>,
    return
  }
  func.func @transform_0(%arg0: i32, %arg1: i32) -> (i32, i32) {
    %c0_i32 = arith.constant 0 : i32
    %c0_i32_0 = arith.constant 0 : i32
    return %arg0, %c0_i32 : i32, i32
  }
  func.func @transform_1(%arg0: i32, %arg1: i32) -> (i32, i32) {
    %c0_i32 = arith.constant 0 : i32
    %c0_i32_0 = arith.constant 0 : i32
    %c0_i32_1 = arith.constant 0 : i32
    return %c0_i32, %c0_i32_0 : i32, i32
  }
  func.func @transform_2(%arg0: i32, %arg1: i32) -> (i32, i32) {
    %c0_i32 = arith.constant 0 : i32
    %c0_i32_0 = arith.constant 0 : i32
    %c0_i32_1 = arith.constant 0 : i32
    return %c0_i32, %c0_i32_0 : i32, i32
  }
  func.func @transform_3(%arg0: i32, %arg1: i32) -> (i32, i32) {
    %c0_i32 = arith.constant 0 : i32
    %c0_i32_0 = arith.constant 0 : i32
    return %c0_i32, %arg1 : i32, i32
  }
  func.func @transform_4(%arg0: i32, %arg1: i32) -> (i32, i32) {
    %c0_i32 = arith.constant 0 : i32
    %c0_i32_0 = arith.constant 0 : i32
    return %c0_i32, %arg1 : i32, i32
  }
  func.func @transform_5(%arg0: i32, %arg1: i32) -> (i32, i32) {
    %c0_i32 = arith.constant 0 : i32
    return %arg0, %arg1 : i32, i32
  }
}

module attributes {stable_mosaic.version = 11 : i64} {
  func.func @_ln_matmul_kernel(%arg0: i32, %arg1: i32, %arg2: memref<64x32xf32, #tpu.memory_space<vmem>>, %arg3: memref<1x32xf32, #tpu.memory_space<vmem>>, %arg4: memref<1x32xf32, #tpu.memory_space<vmem>>, %arg5: memref<32x128xbf16, #tpu.memory_space<vmem>>, %arg6: memref<1x128xf32, #tpu.memory_space<vmem>>, %arg7: memref<64x128xf32, #tpu.memory_space<vmem>>) attributes {dimension_semantics = [#tpu.dimension_semantics<parallel>, #tpu.dimension_semantics<parallel>], iteration_bounds = array<i64: 1, 1>, scalar_prefetch = 0 : i64, scratch_operands = 0 : i64, tpu.core_type = #tpu.core_type<tc>, window_params = [{transform_indices = @transform_0, window_bounds = array<i64: 64, 32>}, {pipeline_mode = #tpu.pipeline_mode<synchronous>, transform_indices = @transform_1, window_bounds = array<i64: 1, 32>}, {pipeline_mode = #tpu.pipeline_mode<synchronous>, transform_indices = @transform_2, window_bounds = array<i64: 1, 32>}, {transform_indices = @transform_3, window_bounds = array<i64: 32, 128>}, {transform_indices = @transform_4, window_bounds = array<i64: 1, 128>}, {transform_indices = @transform_5, window_bounds = array<i64: 64, 128>}]} {
    %c0 = arith.constant 0 : index
    %c0_0 = arith.constant 0 : index
    %0 = vector.load %arg2[%c0, %c0_0] : memref<64x32xf32, #tpu.memory_space<vmem>>, vector<64x32xf32>
    %cst = arith.constant dense<0.000000e+00> : vector<64xf32>
    %1 = vector.multi_reduction <add>, %0, %cst [1] : vector<64x32xf32> to vector<64xf32>
    %2 = vector.shape_cast %1 : vector<64xf32> to vector<64x1xf32>
    %cst_1 = arith.constant 3.200000e+01 : f32
    %3 = vector.broadcast %cst_1 : f32 to vector<64x1xf32>
    %4 = arith.divf %2, %3 : vector<64x1xf32>
    %5 = vector.broadcast %4 : vector<64x1xf32> to vector<64x32xf32>
    %6 = arith.subf %0, %5 : vector<64x32xf32>
    %7 = arith.mulf %6, %6 : vector<64x32xf32>
    %cst_2 = arith.constant dense<0.000000e+00> : vector<64xf32>
    %8 = vector.multi_reduction <add>, %7, %cst_2 [1] : vector<64x32xf32> to vector<64xf32>
    %9 = vector.shape_cast %8 : vector<64xf32> to vector<64x1xf32>
    %cst_3 = arith.constant 3.200000e+01 : f32
    %10 = vector.broadcast %cst_3 : f32 to vector<64x1xf32>
    %11 = arith.divf %9, %10 : vector<64x1xf32>
    %12 = vector.broadcast %4 : vector<64x1xf32> to vector<64x32xf32>
    %13 = arith.subf %0, %12 : vector<64x32xf32>
    %cst_4 = arith.constant 9.99999974E-6 : f32
    %14 = vector.broadcast %cst_4 : f32 to vector<64x1xf32>
    %15 = arith.addf %11, %14 : vector<64x1xf32>
    %16 = math.rsqrt %15 : vector<64x1xf32>
    %17 = vector.broadcast %16 : vector<64x1xf32> to vector<64x32xf32>
    %18 = arith.mulf %13, %17 : vector<64x32xf32>
    %c0_5 = arith.constant 0 : index
    %c0_6 = arith.constant 0 : index
    %19 = vector.load %arg3[%c0_5, %c0_6] : memref<1x32xf32, #tpu.memory_space<vmem>>, vector<1x32xf32>
    %20 = vector.broadcast %19 : vector<1x32xf32> to vector<64x32xf32>
    %21 = arith.mulf %18, %20 : vector<64x32xf32>
    %c0_7 = arith.constant 0 : index
    %c0_8 = arith.constant 0 : index
    %22 = vector.load %arg4[%c0_7, %c0_8] : memref<1x32xf32, #tpu.memory_space<vmem>>, vector<1x32xf32>
    %23 = vector.broadcast %22 : vector<1x32xf32> to vector<64x32xf32>
    %24 = arith.addf %21, %23 : vector<64x32xf32>
    %25 = arith.truncf %24 : vector<64x32xf32> to vector<64x32xbf16>
    %c0_9 = arith.constant 0 : index
    %c0_10 = arith.constant 0 : index
    %26 = vector.load %arg5[%c0_9, %c0_10] : memref<32x128xbf16, #tpu.memory_space<vmem>>, vector<32x128xbf16>
    %cst_11 = arith.constant dense<0.000000e+00> : vector<64x128xf32>
    %27 = tpu.matmul %25, %26, %cst_11 {dimension_numbers = #tpu.dot_dimension_numbers<[1], [0], [0], [1], [0, 0, 1, 1], [], []>} : vector<64x32xbf16>, vector<32x128xbf16>, vector<64x128xf32> -> vector<64x128xf32>
    %c0_12 = arith.constant 0 : index
    %c0_13 = arith.constant 0 : index
    %28 = vector.load %arg6[%c0_12, %c0_13] : memref<1x128xf32, #tpu.memory_space<vmem>>, vector<1x128xf32>
    %29 = vector.broadcast %28 : vector<1x128xf32> to vector<64x128xf32>
    %30 = arith.addf %27, %29 : vector<64x128xf32>
    %c0_14 = arith.constant 0 : index
    %c0_15 = arith.constant 0 : index
    %31 = vector.load %arg7[%c0_14, %c0_15] : memref<64x128xf32, #tpu.memory_space<vmem>>, vector<64x128xf32>
    tpu.vector_store %arg7[%c0_14, %c0_15], %30 {strides = array<i32>} : memref<64x128xf32, #tpu.memory_space<vmem>>, vector<64x128xf32>,
    return
  }
  func.func @transform_0(%arg0: i32, %arg1: i32) -> (i32, i32) {
    %c0_i32 = arith.constant 0 : i32
    %c0_i32_0 = arith.constant 0 : i32
    return %arg0, %c0_i32 : i32, i32
  }
  func.func @transform_1(%arg0: i32, %arg1: i32) -> (i32, i32) {
    %c0_i32 = arith.constant 0 : i32
    %c0_i32_0 = arith.constant 0 : i32
    %c0_i32_1 = arith.constant 0 : i32
    return %c0_i32, %c0_i32_0 : i32, i32
  }
  func.func @transform_2(%arg0: i32, %arg1: i32) -> (i32, i32) {
    %c0_i32 = arith.constant 0 : i32
    %c0_i32_0 = arith.constant 0 : i32
    %c0_i32_1 = arith.constant 0 : i32
    return %c0_i32, %c0_i32_0 : i32, i32
  }
  func.func @transform_3(%arg0: i32, %arg1: i32) -> (i32, i32) {
    %c0_i32 = arith.constant 0 : i32
    %c0_i32_0 = arith.constant 0 : i32
    return %c0_i32, %arg1 : i32, i32
  }
  func.func @transform_4(%arg0: i32, %arg1: i32) -> (i32, i32) {
    %c0_i32 = arith.constant 0 : i32
    %c0_i32_0 = arith.constant 0 : i32
    return %c0_i32, %arg1 : i32, i32
  }
  func.func @transform_5(%arg0: i32, %arg1: i32) -> (i32, i32) {
    %c0_i32 = arith.constant 0 : i32
    return %arg0, %arg1 : i32, i32
  }
}

</mosaic_0001>

<bundles_post_ra>
// kernel: forward.12
= control target key start
LH: loop header
LB: loop body
LE: loop exit
PB: predicated region body
PF: predicated region fallthrough
CT: control target
= control target key end

     0   :  { %vm62_vm0 = vcmask 1040384   ;;  %vm19_vm1 = vcmask 261120   ;;  %vm49_vm2 = vcmask 15360   ;;  %v211_v3 = vmov 0.0   ;;  %s317_s1 = inlined_call_operand.vmem [shape: bf16[2,32], index: 1, kind: input, shape index: {}]   ;;  %s318_s0 = inlined_call_operand.vmem [shape: f32[64,2], index: 0, kind: input, shape index: {}]   ;;  %s319_s2 = inlined_call_operand.vmem [shape: f32[1,32], index: 2, kind: input, shape index: {}]   ;;  %s320_s3 = inlined_call_operand.vmem [shape: f32[64,32], index: 3, kind: output, shape index: {}]  }
   0x1   :  { %v48_v0 = vld [vmem:[%s317_s1] sm:$0x1]  ;;  %v37_v2 = vld [vmem:[%s318_s0 + $0x8] sm:$0xff]  ;;  %22 = vst.msk [vmem:[#allocation2 + $0x10] sm:$0xff] %vm19_vm1, %v211_v3  ;;  %20 = vst.msk [vmem:[#allocation2] sm:$0xff] %vm19_vm1, %v211_v3 }
   0x2   :  { %v36_v1 = vld [vmem:[%s318_s0] sm:$0xff]  ;;  %21 = vst.msk [vmem:[#allocation2 + $0x8] sm:$0xff] %vm19_vm1, %v211_v3  ;;  %23 = vst.msk [vmem:[#allocation2 + $0x18] sm:$0xff] %vm19_vm1, %v211_v3  ;;  %208 = vmatprep.subr.msk.bf16.mxu0 %vm62_vm0, %v48_v0  ;;  %209 = vmatprep.subr.msk.bf16.mxu1 %vm62_vm0, %v48_v0  ;;  %v64_v4 = vsel %vm62_vm0, %v48_v0, 0  ;;  %v41_v7 = vld [vmem:[%s318_s0 + $0x28] sm:$0xff] }
   0x3   :  { %24 = vst.msk [vmem:[#allocation2 + $0x20] sm:$0xff] %vm19_vm1, %v211_v3  ;;  %25 = vst.msk [vmem:[#allocation2 + $0x28] sm:$0xff] %vm19_vm1, %v211_v3  ;;  %v44_v5 = vpack.c.bf16 %v37_v2, %v36_v1  ;;  %v40_v6 = vld [vmem:[%s318_s0 + $0x20] sm:$0xff]  ;;  %v38_v8 = vld [vmem:[%s318_s0 + $0x10] sm:$0xff]  ;;  %197 = vmatpush3.bf16.msra.mxu0 %v64_v4  ;;  %207 = vmatpush3.bf16.msra.mxu1 %v64_v4 }
   0x4   :  { %26 = vst.msk [vmem:[#allocation2 + $0x30] sm:$0xff] %vm19_vm1, %v211_v3  ;;  %27 = vst.msk [vmem:[#allocation2 + $0x38] sm:$0xff] %vm19_vm1, %v211_v3  ;;  %v46_v9 = vpack.c.bf16 %v41_v7, %v40_v6  ;;  %v39_v10 = vld [vmem:[%s318_s0 + $0x18] sm:$0xff]  ;;  %v42_v11 = vld [vmem:[%s318_s0 + $0x30] sm:$0xff] }
   0x5   :  { %v43_v12 = vld [vmem:[%s318_s0 + $0x38] sm:$0xff]  ;;  %198 = vmatprep.mubr.msk.bf16.mxu0 %vm49_vm2, %v44_v5  ;;  %v45_v13 = vpack.c.bf16 %v39_v10, %v38_v8  ;;  %v190_v39 = vld [vmem:[%s319_s2] ss:$0 sm:$0xff] }
   0x6   :  { %v47_v14 = vpack.c.bf16 %v43_v12, %v42_v11  ;;  %202 = vmatprep.mubr.msk.bf16.mxu1 %vm49_vm2, %v46_v9 }
   0x7   :  { %199 = vmatmul.mubr.msk.bf16.vlgmr.msra.gmra.mrb[0].mxu0 %vm49_vm2, %v45_v13 }
   0x8   :  { %203 = vmatmul.mubr.msk.bf16.vlgmr.msra.gmra.mrb[0].mxu1 %vm49_vm2, %v47_v14  ;;  %v30_v15 = vld [vmem:[#allocation2 + $0x10] sm:$0xff]  ;;  %v28_v17 = vld [vmem:[#allocation2] sm:$0xff] }
   0x9   :  { %v31_v21 = vld [vmem:[#allocation2 + $0x18] sm:$0xff]  ;;  %v29_v27 = vld [vmem:[#allocation2 + $0x8] sm:$0xff] }
   0xa   :  { %v32_v18 = vld [vmem:[#allocation2 + $0x20] sm:$0xff]  ;;  %v33_v28 = vld [vmem:[#allocation2 + $0x28] sm:$0xff] }
   0xb   :  { %v34_v16 = vld [vmem:[#allocation2 + $0x30] sm:$0xff]  ;;  %v35_v22 = vld [vmem:[#allocation2 + $0x38] sm:$0xff] }
  0xda   :  { %v200_v19 = vpop.f32.mrb[0].mxu0 }
  0xdb   :  { %v204_v20 = vpop.f32.mrb[0].mxu1  ;;  %v133_v23 = vadd.f32 %v200_v19, %v30_v15  ;;  %v100_v25 = vpop.f32.mrb[1].mxu0 }
  0xdc   :  { %v137_v24 = vadd.f32 %v204_v20, %v34_v16  ;;  %v116_v26 = vpop.f32.mrb[1].mxu1  ;;  %v131_v29 = vadd.f32 %v100_v25, %v28_v17  ;;  %v201_v31 = vpop.f32.mrb[2].mxu0 }
  0xdd   :  { %v135_v30 = vadd.f32 %v116_v26, %v32_v18  ;;  %v205_v32 = vpop.f32.mrb[2].mxu1  ;;  %142 = vst.msk [vmem:[#allocation2 + $0x10] sm:$0xff] %vm19_vm1, %v133_v23  ;;  %v134_v33 = vadd.f32 %v201_v31, %v31_v21  ;;  %v103_v35 = vpop.f32.mrb[3].mxu0 }
  0xde   :  { %146 = vst.msk [vmem:[#allocation2 + $0x30] sm:$0xff] %vm19_vm1, %v137_v24  ;;  %v138_v34 = vadd.f32 %v205_v32, %v35_v22  ;;  %v119_v36 = vpop.f32.mrb[3].mxu1  ;;  %140 = vst.msk [vmem:[#allocation2] sm:$0xff] %vm19_vm1, %v131_v29  ;;  %v132_v37 = vadd.f32 %v103_v35, %v29_v27 }
  0xdf   :  { %144 = vst.msk [vmem:[#allocation2 + $0x20] sm:$0xff] %vm19_vm1, %v135_v30  ;;  %v136_v38 = vadd.f32 %v119_v36, %v33_v28  ;;  %143 = vst.msk [vmem:[#allocation2 + $0x18] sm:$0xff] %vm19_vm1, %v134_v33 }
  0xe0   :  { %147 = vst.msk [vmem:[#allocation2 + $0x38] sm:$0xff] %vm19_vm1, %v138_v34  ;;  %141 = vst.msk [vmem:[#allocation2 + $0x8] sm:$0xff] %vm19_vm1, %v132_v37 }
  0xe1   :  { %145 = vst.msk [vmem:[#allocation2 + $0x28] sm:$0xff] %vm19_vm1, %v136_v38 }
  0xe4   :  { %v153_v40 = vld [vmem:[#allocation2 + $0x10] sm:$0xff] }
  0xe5   :  { %v157_v41 = vld [vmem:[#allocation2 + $0x30] sm:$0xff]  ;;  %v168_v42 = vadd.f32 %v190_v39, %v153_v40  ;;  %v151_v44 = vld [vmem:[#allocation2] sm:$0xff] }
  0xe6   :  { %v172_v43 = vadd.f32 %v190_v39, %v157_v41  ;;  %v155_v45 = vld [vmem:[#allocation2 + $0x20] sm:$0xff]  ;;  %v166_v46 = vadd.f32 %v190_v39, %v151_v44  ;;  %v154_v48 = vld [vmem:[#allocation2 + $0x18] sm:$0xff] }
  0xe7   :  { %v170_v47 = vadd.f32 %v190_v39, %v155_v45  ;;  %v158_v49 = vld [vmem:[#allocation2 + $0x38] sm:$0xff]  ;;  %176 = vst.msk [vmem:[%s320_s3 + $0x10] sm:$0xff] %vm19_vm1, %v168_v42  ;;  %v169_v50 = vadd.f32 %v190_v39, %v154_v48  ;;  %v152_v52 = vld [vmem:[#allocation2 + $0x8] sm:$0xff] }
  0xe8   :  { %180 = vst.msk [vmem:[%s320_s3 + $0x30] sm:$0xff] %vm19_vm1, %v172_v43  ;;  %v173_v51 = vadd.f32 %v190_v39, %v158_v49  ;;  %v156_v53 = vld [vmem:[#allocation2 + $0x28] sm:$0xff]  ;;  %174 = vst.msk [vmem:[%s320_s3] sm:$0xff] %vm19_vm1, %v166_v46  ;;  %v167_v54 = vadd.f32 %v190_v39, %v152_v52 }
  0xe9   :  { %178 = vst.msk [vmem:[%s320_s3 + $0x20] sm:$0xff] %vm19_vm1, %v170_v47  ;;  %v171_v55 = vadd.f32 %v190_v39, %v156_v53  ;;  %177 = vst.msk [vmem:[%s320_s3 + $0x18] sm:$0xff] %vm19_vm1, %v169_v50 }
  0xea   :  { %181 = vst.msk [vmem:[%s320_s3 + $0x38] sm:$0xff] %vm19_vm1, %v173_v51  ;;  %175 = vst.msk [vmem:[%s320_s3 + $0x8] sm:$0xff] %vm19_vm1, %v167_v54 }
  0xeb   :  { %179 = vst.msk [vmem:[%s320_s3 + $0x28] sm:$0xff] %vm19_vm1, %v171_v55 }

// kernel: forward.13
= control target key start
LH: loop header
LB: loop body
LE: loop exit
PB: predicated region body
PF: predicated region fallthrough
CT: control target
= control target key end

     0   :  { %vm29_vm0 = vcmask 261120   ;;  %vm269_vm1 = vcmask 785408   ;;  %s492_s0 = inlined_call_operand.vmem [shape: f32[64,32], index: 0, kind: input, shape index: {}]   ;;  %s493_s3 = inlined_call_operand.vmem [shape: bf16[32,96], index: 3, kind: input, shape index: {}]   ;;  %s494_s1 = inlined_call_operand.vmem [shape: f32[1,32], index: 1, kind: input, shape index: {}]   ;;  %s495_s2 = inlined_call_operand.vmem [shape: f32[1,32], index: 2, kind: input, shape index: {}]   ;;  %s496_s4 = inlined_call_operand.vmem [shape: f32[1,96], index: 4, kind: input, shape index: {}]   ;;  %s497_s5 = inlined_call_operand.vmem [shape: f32[64,96], index: 5, kind: output, shape index: {}]  }
   0x1   :  { %v21_v0 = vld [vmem:[%s492_s0] sm:$0xff]  ;;  %v22_v2 = vld [vmem:[%s492_s0 + $0x8] sm:$0xff]  ;;  %v23_v8 = vld [vmem:[%s492_s0 + $0x10] sm:$0xff] }
   0x2   :  { %v25_v1 = vld [vmem:[%s492_s0 + $0x20] sm:$0xff]  ;;  %v30_v3 = vsel %vm29_vm0, %v21_v0, 0.0  ;;  %v26_v5 = vld [vmem:[%s492_s0 + $0x28] sm:$0xff]  ;;  %v33_v6 = vsel %vm29_vm0, %v22_v2, 0.0  ;;  %v24_v9 = vld [vmem:[%s492_s0 + $0x18] sm:$0xff]  ;;  %v36_v10 = vsel %vm29_vm0, %v23_v8, 0.0 }
   0x3   :  { %v42_v4 = vsel %vm29_vm0, %v25_v1, 0.0  ;;  %31 = vadd.xlane.f32.xlu0 %v30_v3  ;;  %v45_v7 = vsel %vm29_vm0, %v26_v5, 0.0  ;;  %v39_v11 = vsel %vm29_vm0, %v24_v9, 0.0  ;;  %v27_v12 = vld [vmem:[%s492_s0 + $0x30] sm:$0xff]  ;;  %v28_v13 = vld [vmem:[%s492_s0 + $0x38] sm:$0xff]  ;;  %v313_v56 = vld [vmem:[%s493_s3] sm:$0xff]  }
   0x4   :  { %43 = vadd.xlane.f32.xlu1 %v42_v4  ;;  %v48_v14 = vsel %vm29_vm0, %v27_v12, 0.0  ;;  %v51_v15 = vsel %vm29_vm0, %v28_v13, 0.0  ;;  %297 = vmatprep.subr.bf16.mxu0 %v313_v56  ;;  %v314_v57 = vld [vmem:[%s493_s3 + $0x8] sm:$0xff]  }
   0x5   :  { %309 = vmatprep.subr.bf16.mxu1 %v313_v56  ;;  %298 = vmatpush3.bf16.msra.mxu0 %v313_v56 }
   0x6   :  { %311 = vmatpush3.bf16.msra.mxu1 %v313_v56  ;;  %299 = vmatprep.subr.bf16.mxu0 %v314_v57 }
   0x7   :  { %34 = vadd.xlane.f32.xlu0 %v33_v6  ;;  %310 = vmatprep.subr.bf16.mxu1 %v314_v57 }
   0x8   :  { %46 = vadd.xlane.f32.xlu1 %v45_v7 }
   0x9   :  { %300 = vmatpush3.bf16.msra.mxu0 %v314_v57 }
   0xa   :  { %312 = vmatpush3.bf16.msra.mxu1 %v314_v57 }
   0xb   :  { %37 = vadd.xlane.f32.xlu0 %v36_v10 }
   0xc   :  { %40 = vadd.xlane.f32.xlu1 %v39_v11 }
   0xf   :  { %49 = vadd.xlane.f32.xlu0 %v48_v14 }
  0x10   :  { %52 = vadd.xlane.f32.xlu1 %v51_v15 }
  0x90   :  { %v32_v16 = vpop.xlane.xlu0 %31 }
  0x91   :  { %v44_v17 = vpop.xlane.xlu1 %43  ;;  %v55_v18 = vmul.f32 0.03125, %v32_v16 }
  0x92   :  { %v59_v19 = vmul.f32 0.03125, %v44_v17 }
  0x93   :  { %v393_v20 = vsub.f32 %v21_v0, %v55_v18 }
  0x94   :  { %v395_v21 = vsub.f32 %v25_v1, %v59_v19  ;;  %v35_v22 = vpop.xlane.xlu0 %34  ;;  %v282_v19 = vld [vmem:[%s494_s1] ss:$0 sm:$0xff] }
  0x95   :  { %v47_v23 = vpop.xlane.xlu1 %46  ;;  %v56_v24 = vmul.f32 0.03125, %v35_v22  ;;  %v71_v26 = vmul.f32 %v393_v20, %v393_v20 }
  0x96   :  { %v60_v25 = vmul.f32 0.03125, %v47_v23  ;;  %v75_v27 = vmul.f32 %v395_v21, %v395_v21 }
  0x97   :  { %v401_v28 = vsub.f32 %v22_v2, %v56_v24  ;;  %v79_v30 = vsel %vm29_vm0, %v71_v26, 0.0 }
  0x98   :  { %v403_v29 = vsub.f32 %v26_v5, %v60_v25  ;;  %80 = vadd.xlane.f32.xlu0 %v79_v30  ;;  %v38_v31 = vpop.xlane.xlu0 %37  ;;  %v91_v33 = vsel %vm29_vm0, %v75_v27, 0.0  ;;  %v283_v27 = vld [vmem:[%s495_s2] ss:$0 sm:$0xff] }
  0x99   :  { %v41_v32 = vpop.xlane.xlu1 %40  ;;  %v57_v34 = vmul.f32 0.03125, %v38_v31  ;;  %v72_v36 = vmul.f32 %v401_v28, %v401_v28 }
  0x9a   :  { %v58_v35 = vmul.f32 0.03125, %v41_v32  ;;  %v76_v37 = vmul.f32 %v403_v29, %v403_v29 }
  0x9b   :  { %v411_v38 = vsub.f32 %v23_v8, %v57_v34  ;;  %v82_v40 = vsel %vm29_vm0, %v72_v36, 0.0 }
  0x9c   :  { %v413_v39 = vsub.f32 %v24_v9, %v58_v35  ;;  %92 = vadd.xlane.f32.xlu0 %v91_v33  ;;  %83 = vadd.xlane.f32.xlu1 %v82_v40  ;;  %v50_v41 = vpop.xlane.xlu0 %49  ;;  %v94_v43 = vsel %vm29_vm0, %v76_v37, 0.0 }
  0x9d   :  { %v53_v42 = vpop.xlane.xlu1 %52  ;;  %v61_v44 = vmul.f32 0.03125, %v50_v41  ;;  %v73_v46 = vmul.f32 %v411_v38, %v411_v38 }
  0x9e   :  { %v62_v45 = vmul.f32 0.03125, %v53_v42  ;;  %v74_v47 = vmul.f32 %v413_v39, %v413_v39 }
  0x9f   :  { %v421_v48 = vsub.f32 %v27_v12, %v61_v44  ;;  %v85_v50 = vsel %vm29_vm0, %v73_v46, 0.0 }
  0xa0   :  { %v423_v49 = vsub.f32 %v28_v13, %v62_v45  ;;  %95 = vadd.xlane.f32.xlu1 %v94_v43  ;;  %86 = vadd.xlane.f32.xlu0 %v85_v50  ;;  %v88_v51 = vsel %vm29_vm0, %v74_v47, 0.0 }
  0xa1   :  { %v77_v52 = vmul.f32 %v421_v48, %v421_v48 }
  0xa2   :  { %v78_v53 = vmul.f32 %v423_v49, %v423_v49 }
  0xa3   :  { %v97_v54 = vsel %vm29_vm0, %v77_v52, 0.0 }
  0xa4   :  { %89 = vadd.xlane.f32.xlu1 %v88_v51  ;;  %98 = vadd.xlane.f32.xlu0 %v97_v54  ;;  %v100_v55 = vsel %vm29_vm0, %v78_v53, 0.0 }
  0xa8   :  { %101 = vadd.xlane.f32.xlu1 %v100_v55 }
 0x125   :  { %v81_v58 = vpop.xlane.xlu0 %80 }
 0x126   :  { %v103_v59 = vmul.f32 0.03125, %v81_v58 }
 0x128   :  { %v111_v60 = vadd.f32 1e-05, %v103_v59 }
 0x129   :  { %v84_v61 = vpop.xlane.xlu1 %83  ;;  %v93_v62 = vpop.xlane.xlu0 %92 }
 0x12a   :  { %315 = vrsqrt.f32 %v111_v60  ;;  %v104_v63 = vmul.f32 0.03125, %v84_v61  ;;  %v107_v0 = vmul.f32 0.03125, %v93_v62 }
 0x12c   :  { %v112_v1 = vadd.f32 1e-05, %v104_v63  ;;  %v115_v2 = vadd.f32 1e-05, %v107_v0 }
 0x12d   :  { %v96_v3 = vpop.xlane.xlu1 %95  ;;  %v87_v4 = vpop.xlane.xlu0 %86 }
 0x12e   :  { %317 = vrsqrt.f32 %v112_v1  ;;  %v108_v5 = vmul.f32 0.03125, %v96_v3  ;;  %v105_v6 = vmul.f32 0.03125, %v87_v4 }
 0x12f   :  { %319 = vrsqrt.f32 %v115_v2 }
 0x130   :  { %v116_v7 = vadd.f32 1e-05, %v108_v5  ;;  %v113_v8 = vadd.f32 1e-05, %v105_v6 }
 0x131   :  { %v90_v9 = vpop.xlane.xlu1 %89  ;;  %v99_v10 = vpop.xlane.xlu0 %98 }
 0x132   :  { %321 = vrsqrt.f32 %v116_v7  ;;  %v106_v11 = vmul.f32 0.03125, %v90_v9  ;;  %v109_v12 = vmul.f32 0.03125, %v99_v10 }
 0x133   :  { %323 = vrsqrt.f32 %v113_v8 }
 0x134   :  { %v316_v13 = vpop.eup %315  ;;  %v114_v14 = vadd.f32 1e-05, %v106_v11  ;;  %v117_v15 = vadd.f32 1e-05, %v109_v12 }
 0x135   :  { %v102_v16 = vpop.xlane.xlu1 %101  ;;  %v127_v17 = vmul.f32 %v316_v13, %v393_v20 }
 0x136   :  { %325 = vrsqrt.f32 %v114_v14  ;;  %v110_v18 = vmul.f32 0.03125, %v102_v16 }
 0x137   :  { %327 = vrsqrt.f32 %v117_v15  ;;  %v142_v26 = vmul.f32 %v282_v19, %v127_v17 }
 0x138   :  { %v318_v22 = vpop.eup %317  ;;  %v118_v23 = vadd.f32 1e-05, %v110_v18 }
 0x139   :  { %v320_v24 = vpop.eup %319  ;;  %v128_v25 = vmul.f32 %v318_v22, %v401_v28  ;;  %v157_v33 = vadd.f32 %v283_v27, %v142_v26 }
 0x13a   :  { %329 = vrsqrt.f32 %v118_v23  ;;  %v131_v20 = vmul.f32 %v320_v24, %v395_v21 }
 0x13b   :  { %v143_v30 = vmul.f32 %v282_v19, %v128_v25 }
 0x13c   :  { %v322_v31 = vpop.eup %321  ;;  %v146_v36 = vmul.f32 %v282_v19, %v131_v20 }
 0x13d   :  { %v324_v32 = vpop.eup %323  ;;  %v158_v34 = vadd.f32 %v283_v27, %v143_v30  ;;  %v132_v35 = vmul.f32 %v322_v31, %v403_v29 }
 0x13e   :  { %v129_v37 = vmul.f32 %v324_v32, %v411_v38  ;;  %v161_v44 = vadd.f32 %v283_v27, %v146_v36 }
 0x13f   :  { %v165_v40 = vpack.c.bf16 %v158_v34, %v157_v33  ;;  %v147_v28 = vmul.f32 %v282_v19, %v132_v35 }
 0x140   :  { %v326_v41 = vpop.eup %325  ;;  %v144_v45 = vmul.f32 %v282_v19, %v129_v37 }
 0x141   :  { %v328_v42 = vpop.eup %327  ;;  %v130_v43 = vmul.f32 %v326_v41, %v413_v39  ;;  %301 = vmatprep.mubr.msk.bf16.mxu0 %vm29_vm0, %v165_v40  ;;  %v162_v21 = vadd.f32 %v283_v27, %v147_v28 }
 0x142   :  { %v133_v46 = vmul.f32 %v328_v42, %v421_v48  ;;  %v159_v38 = vadd.f32 %v283_v27, %v144_v45  ;;  %v284_v48 = vld [vmem:[%s496_s4] ss:$0 sm:$0xff] }
 0x143   :  { %v167_v47 = vpack.c.bf16 %v162_v21, %v161_v44  ;;  %v145_v50 = vmul.f32 %v282_v19, %v130_v43 }
 0x144   :  { %v330_v51 = vpop.eup %329  ;;  %v148_v53 = vmul.f32 %v282_v19, %v133_v46 }
 0x145   :  { %v134_v29 = vmul.f32 %v330_v51, %v423_v49  ;;  %305 = vmatprep.mubr.msk.bf16.mxu1 %vm29_vm0, %v167_v47  ;;  %v160_v52 = vadd.f32 %v283_v27, %v145_v50 }
 0x146   :  { %v163_v39 = vadd.f32 %v283_v27, %v148_v53 }
 0x147   :  { %v166_v54 = vpack.c.bf16 %v160_v52, %v159_v38  ;;  %v149_v55 = vmul.f32 %v282_v19, %v134_v29 }
 0x149   :  { %302 = vmatmul.mubr.msk.bf16.vlgmr.msra.gmra.mrb[0].mxu0 %vm29_vm0, %v166_v54  ;;  %v164_v56 = vadd.f32 %v283_v27, %v149_v55 }
 0x14b   :  { %v168_v57 = vpack.c.bf16 %v164_v56, %v163_v39 }
 0x14d   :  { %306 = vmatmul.mubr.msk.bf16.vlgmr.msra.gmra.mrb[0].mxu1 %vm29_vm0, %v168_v57 }
 0x21c   :  { %v303_v58 = vpop.f32.mrb[0].mxu0 }
 0x21d   :  { %v247_v49 = vadd.f32 %v303_v58, %v284_v48  ;;  %v238_v59 = vpop.f32.mrb[1].mxu0 }
 0x21e   :  { %v239_v60 = vadd.f32 %v284_v48, %v238_v59  ;;  %v304_v61 = vpop.f32.mrb[2].mxu0 }
 0x21f   :  { %272 = vst.msk [vmem:[%s497_s5 + $0x10] sm:$0xff] %vm269_vm1, %v247_v49  ;;  %v250_v62 = vadd.f32 %v304_v61, %v284_v48  ;;  %v241_v63 = vpop.f32.mrb[3].mxu0 }
 0x220   :  { %270 = vst.msk [vmem:[%s497_s5] sm:$0xff] %vm269_vm1, %v239_v60  ;;  %v242_v0 = vadd.f32 %v284_v48, %v241_v63  ;;  %v307_v1 = vpop.f32.mrb[0].mxu1 }
 0x221   :  { %273 = vst.msk [vmem:[%s497_s5 + $0x18] sm:$0xff] %vm269_vm1, %v250_v62  ;;  %v263_v2 = vadd.f32 %v307_v1, %v284_v48  ;;  %v254_v3 = vpop.f32.mrb[1].mxu1 }
 0x222   :  { %271 = vst.msk [vmem:[%s497_s5 + $0x8] sm:$0xff] %vm269_vm1, %v242_v0  ;;  %v255_v4 = vadd.f32 %v284_v48, %v254_v3  ;;  %v308_v5 = vpop.f32.mrb[2].mxu1 }
 0x223   :  { %276 = vst.msk [vmem:[%s497_s5 + $0x30] sm:$0xff] %vm269_vm1, %v263_v2  ;;  %v266_v6 = vadd.f32 %v308_v5, %v284_v48  ;;  %v257_v7 = vpop.f32.mrb[3].mxu1 }
 0x224   :  { %274 = vst.msk [vmem:[%s497_s5 + $0x20] sm:$0xff] %vm269_vm1, %v255_v4  ;;  %v258_v8 = vadd.f32 %v284_v48, %v257_v7 }
 0x225   :  { %277 = vst.msk [vmem:[%s497_s5 + $0x38] sm:$0xff] %vm269_vm1, %v266_v6 }
 0x226   :  { %275 = vst.msk [vmem:[%s497_s5 + $0x28] sm:$0xff] %vm269_vm1, %v258_v8 }

// kernel: forward.14
= control target key start
LH: loop header
LB: loop body
LE: loop exit
PB: predicated region body
PF: predicated region fallthrough
CT: control target
= control target key end

     0   :  { %s899_s12 = smov 0   ;;  %s980_s0 = inlined_call_operand.vmem [shape: f32[8,4,8,8], index: 0, kind: input, shape index: {}]   ;;  %s981_s1 = inlined_call_operand.vmem [shape: f32[8,4,8,8], index: 1, kind: input, shape index: {}]   ;;  %s982_s2 = inlined_call_operand.vmem [shape: f32[8,4,8,8], index: 2, kind: input, shape index: {}]   ;;  %s983_s3 = inlined_call_operand.vmem [shape: f32[8,4,8,8], index: 3, kind: output, shape index: {}]  }
   0x1 LB: > { %s752_s13 = sadd.s32 4294967295, %s875_s12   ;;  %p756_p0 = scmp.ge.s32.totalorder %s875_s12, 1  ;;  %s875_s12 = sphi %s899_s12, %s13_s12  }
   0x2   : > { %p157_p1 = scmp.lt.s32.totalorder %s875_s12, 9 }
   0x4   : > { %p158_p2 = pnand %p756_p0, %p157_p1 }
   0x5   : > { %p191_p3 = scmp.lt.s32.totalorder (!%p158_p2), %s752_s13, 7  ;;  %v877_v0 = vmov (!%p158_p2), 0.0   ;;  %vm878_vm0 = vmmov (!%p158_p2), 0   ;;  %vm236_vm1 = vcmask (!%p158_p2), 64512   ;;  %v425_v21 = vlaneseq (!%p158_p2) }
   0x6   : > { %161 = sbr.rel (%p158_p2) target bundleno = 785 (0x311), region = 32  ;;  %795 = vmatprep.subr.bf16.mxu0 (!%p158_p2), %v877_v0  ;;  %801 = vmatprep.subr.bf16.mxu1 (!%p158_p2), %v877_v0  ;;  %vm487_vm3 = vcmask (!%p158_p2), 1043456  }
   0x7   : > { %797 = vmatprep.mubr.msk.bf16.mxu0 (!%p158_p2), %vm878_vm0, %v877_v0  ;;  %803 = vmatprep.mubr.msk.bf16.mxu1 (!%p158_p2), %vm878_vm0, %v877_v0  ;;  %v426_v22 = vshrl.u32 (!%p158_p2), %v425_v21, 7  ;;  %v428_v23 = vand.u32 (!%p158_p2), 127, %v425_v21 }
   0x9   : > { %vm429_vm2 = vcmp.ge.s32.totalorder (!%p158_p2), %v426_v22, %v428_v23 }
   0xd   : > { %s985_s13 = smov (!%p191_p3, %s752_s13), 7 }
   0xe   : > { %s913_s14 = sshll.u32 %s985_s13, 5 }
   0xf   : > { %s200_s17 = scalar_lea.vmem %s981_s1, %s913_s14  ;;  %s195_s20 = scalar_lea.vmem %s980_s0, %s913_s14 }
  0x10   : > { %v220_v1 = vld [vmem:[%s200_s17] sm:$0xff]  ;;  %v221_v2 = vld [vmem:[%s200_s17 + $0x8] sm:$0xff]  ;;  %v222_v5 = vld [vmem:[%s200_s17 + $0x10] sm:$0xff]  ;;  %s205_s23 = scalar_lea.vmem %s982_s2, %s913_s14  ;;  %s210_s26 = scalar_lea.vmem %s983_s3, %s913_s14 }
  0x11   : > { %v224_v3 = vpack.c.bf16 %v220_v1, %v220_v1  ;;  %v225_v4 = vpack.c.bf16 %v221_v2, %v221_v2  ;;  %v223_v6 = vld [vmem:[%s200_s17 + $0x18] sm:$0xff]  ;;  %v212_v9 = vld [vmem:[%s195_s20] sm:$0xff]  ;;  %v213_v10 = vld [vmem:[%s195_s20 + $0x8] sm:$0xff]  ;;  %v226_v11 = vpack.c.bf16 %v222_v5, %v222_v5 }
  0x12   : > { %v227_v12 = vpack.c.bf16 %v223_v6, %v223_v6  ;;  %v216_v13 = vpack.c.bf16 %v212_v9, %v212_v9  ;;  %v217_v14 = vpack.c.bf16 %v213_v10, %v213_v10  ;;  %v214_v17 = vld [vmem:[%s195_s20 + $0x10] sm:$0xff]  ;;  %v215_v18 = vld [vmem:[%s195_s20 + $0x18] sm:$0xff]  ;;  %v228_v9 = vld [vmem:[%s205_s23] sm:$0xff] }
  0x13   : > { %v241_v7 = vsel %vm236_vm1, %v224_v3, 0  ;;  %v287_v8 = vsel %vm236_vm1, %v225_v4, 0  ;;  %v333_v15 = vsel %vm236_vm1, %v226_v11, 0  ;;  %v218_v19 = vpack.c.bf16 %v214_v17, %v214_v17 }
  0x14   : > { %796 = vmatpush3.bf16.xpose.msra.mxu0 %v241_v7  ;;  %802 = vmatpush3.bf16.xpose.msra.mxu1 %v287_v8  ;;  %v379_v16 = vsel %vm236_vm1, %v227_v12, 0  ;;  %v219_v20 = vpack.c.bf16 %v215_v18, %v215_v18  ;;  %v232_v10 = vpack.c.bf16 %v228_v9, %v228_v9  ;;  %v229_v12 = vld [vmem:[%s205_s23 + $0x8] sm:$0xff]  ;;  %v231_v18 = vld [vmem:[%s205_s23 + $0x18] sm:$0xff] }
  0x15   : > { %807 = vmatprep.subr.bf16.mxu0 %v877_v0  ;;  %813 = vmatprep.subr.bf16.mxu1 %v877_v0 }
  0x16   : > { %v489_v11 = vsel %vm487_vm3, %v232_v10, 0 }
  0x1b   : > { %798 = vmatmul.mubr.msk.bf16.vlgmr.msra.gmra.mrb[0].mxu0 %vm236_vm1, %v216_v13  ;;  %804 = vmatmul.mubr.msk.bf16.vlgmr.msra.gmra.mrb[0].mxu1 %vm236_vm1, %v217_v14  ;;  %v233_v13 = vpack.c.bf16 %v229_v12, %v229_v12 }
  0x1c   : > { %808 = vmatpush3.bf16.xpose.msra.mxu0 %v333_v15  ;;  %814 = vmatpush3.bf16.xpose.msra.mxu1 %v379_v16  ;;  %v230_v15 = vld [vmem:[%s205_s23 + $0x10] sm:$0xff] }
  0x1d   : > { %809 = vmatprep.mubr.msk.bf16.mxu0 %vm878_vm0, %v877_v0  ;;  %815 = vmatprep.mubr.msk.bf16.mxu1 %vm878_vm0, %v877_v0  ;;  %v535_v14 = vsel %vm487_vm3, %v233_v13, 0  ;;  %v234_v16 = vpack.c.bf16 %v230_v15, %v230_v15 }
  0x1e   : > { %819 = vmatprep.subr.bf16.mxu0 %v877_v0  ;;  %825 = vmatprep.subr.bf16.mxu1 %v877_v0 }
  0x1f   : > { %v581_v17 = vsel %vm487_vm3, %v234_v16, 0 }
  0x23   : > { %810 = vmatmul.mubr.msk.bf16.vlgmr.msra.gmra.mrb[4].mxu0 %vm236_vm1, %v218_v19  ;;  %816 = vmatmul.mubr.msk.bf16.vlgmr.msra.gmra.mrb[4].mxu1 %vm236_vm1, %v219_v20  ;;  %v235_v19 = vpack.c.bf16 %v231_v18, %v231_v18 }
  0x24   : > { %821 = vmatprep.mubr.msk.bf16.mxu0 %vm878_vm0, %v877_v0  ;;  %827 = vmatprep.mubr.msk.bf16.mxu1 %vm878_vm0, %v877_v0 }
  0x25   : > { %820 = vmatpush3.bf16.msra.mxu0 %v489_v11  ;;  %826 = vmatpush3.bf16.msra.mxu1 %v535_v14  ;;  %v627_v20 = vsel %vm487_vm3, %v235_v19, 0 }
  0x26   : > { %831 = vmatprep.subr.bf16.mxu0 %v877_v0  ;;  %837 = vmatprep.subr.bf16.mxu1 %v877_v0 }
  0xee   : > { %v277_v24 = vpop.f32.mrb[0].mxu0  ;;  %v323_v25 = vpop.f32.mrb[0].mxu1 }
  0xef   : > { %v421_v26 = vmul.f32 0.35355338, %v277_v24  ;;  %v799_v27 = vpop.f32.mrb[1].mxu0  ;;  %v422_v28 = vmul.f32 0.35355338, %v323_v25  ;;  %v805_v29 = vpop.f32.mrb[1].mxu1 }
  0xf0   : > { %v280_v30 = vpop.f32.mrb[2].mxu0  ;;  %v326_v31 = vpop.f32.mrb[2].mxu1 }
  0xf1   : > { %v800_v32 = vpop.f32.mrb[3].mxu0  ;;  %v806_v33 = vpop.f32.mrb[3].mxu1  ;;  %v432_v34 = vsel %vm429_vm2, %v421_v26, -1e+30  ;;  %v433_v35 = vsel %vm429_vm2, %v422_v28, -1e+30 }
  0xf2   : > { %v436_v36 = vsel %vm236_vm1, %v432_v34, -inf  ;;  %v439_v37 = vsel %vm236_vm1, %v433_v35, -inf }
  0xf3   : > { %437 = vmax.xlane.f32.xlu0 %v436_v36 }
  0xf6   : > { %v369_v38 = vpop.f32.mrb[4].mxu0  ;;  %v415_v39 = vpop.f32.mrb[4].mxu1 }
  0xf7   : > { %v423_v40 = vmul.f32 0.35355338, %v369_v38  ;;  %440 = vmax.xlane.f32.xlu0 %v439_v37  ;;  %v811_v41 = vpop.f32.mrb[5].mxu0  ;;  %v424_v42 = vmul.f32 0.35355338, %v415_v39  ;;  %v817_v43 = vpop.f32.mrb[5].mxu1 }
  0xf8   : > { %v372_v44 = vpop.f32.mrb[6].mxu0  ;;  %v418_v45 = vpop.f32.mrb[6].mxu1 }
  0xf9   : > { %v812_v46 = vpop.f32.mrb[7].mxu0  ;;  %v818_v47 = vpop.f32.mrb[7].mxu1  ;;  %v434_v48 = vsel %vm429_vm2, %v423_v40, -1e+30  ;;  %v435_v49 = vsel %vm429_vm2, %v424_v42, -1e+30 }
  0xfa   : > { %v442_v50 = vsel %vm236_vm1, %v434_v48, -inf  ;;  %v445_v51 = vsel %vm236_vm1, %v435_v49, -inf }
  0xfb   : > { %443 = vmax.xlane.f32.xlu1 %v442_v50 }
  0xff   : > { %446 = vmax.xlane.f32.xlu1 %v445_v51 }
 0x180   : > { %v438_v52 = vpop.xlane.xlu0 %437 }
 0x181   : > { %v448_v53 = vsub.f32 %v432_v34, %v438_v52 }
 0x183   : > { %v452_v54 = vmul.f32 1.442695, %v448_v53 }
 0x184   : > { %v441_v55 = vpop.xlane.xlu0 %440 }
 0x185   : > { %853 = vpow2.f32 %v452_v54  ;;  %v449_v56 = vsub.f32 %v433_v35, %v441_v55 }
 0x187   : > { %v454_v57 = vmul.f32 1.442695, %v449_v56 }
 0x188   : > { %v444_v58 = vpop.xlane.xlu1 %443 }
 0x189   : > { %855 = vpow2.f32 %v454_v57  ;;  %v450_v59 = vsub.f32 %v434_v48, %v444_v58 }
 0x18b   : > { %v456_v60 = vmul.f32 1.442695, %v450_v59 }
 0x18c   : > { %v447_v61 = vpop.xlane.xlu1 %446 }
 0x18d   : > { %857 = vpow2.f32 %v456_v60  ;;  %v451_v62 = vsub.f32 %v435_v49, %v447_v61 }
 0x18f   : > { %v854_v63 = vpop.eup %853  ;;  %v458_v1 = vmul.f32 1.442695, %v451_v62 }
 0x190   : > { %v460_v2 = vsel %vm236_vm1, %v854_v63, 0.0 }
 0x191   : > { %859 = vpow2.f32 %v458_v1  ;;  %461 = vadd.xlane.f32.xlu0 %v460_v2 }
 0x193   : > { %v856_v3 = vpop.eup %855 }
 0x194   : > { %v463_v4 = vsel %vm236_vm1, %v856_v3, 0.0 }
 0x195   : > { %464 = vadd.xlane.f32.xlu1 %v463_v4 }
 0x197   : > { %v858_v5 = vpop.eup %857 }
 0x198   : > { %v466_v6 = vsel %vm236_vm1, %v858_v5, 0.0 }
 0x199   : > { %467 = vadd.xlane.f32.xlu0 %v466_v6 }
 0x19b   : > { %v860_v7 = vpop.eup %859 }
 0x19c   : > { %v469_v8 = vsel %vm236_vm1, %v860_v7, 0.0 }
 0x19d   : > { %470 = vadd.xlane.f32.xlu1 %v469_v8 }
 0x21e   : > { %v462_v21 = vpop.xlane.xlu0 %461 }
 0x21f   : > { %861 = vrcp.f32 %v462_v21 }
 0x222   : > { %v465_v22 = vpop.xlane.xlu1 %464 }
 0x223   : > { %863 = vrcp.f32 %v465_v22 }
 0x226   : > { %v468_v23 = vpop.xlane.xlu0 %467 }
 0x227   : > { %865 = vrcp.f32 %v468_v23 }
 0x229   : > { %v862_v24 = vpop.eup %861 }
 0x22a   : > { %v473_v25 = vmul.f32 %v862_v24, %v854_v63  ;;  %v471_v26 = vpop.xlane.xlu1 %470 }
 0x22b   : > { %867 = vrcp.f32 %v471_v26 }
 0x22c   : > { %v480_v27 = vpack.c.bf16 %v473_v25, %v473_v25 }
 0x22d   : > { %v864_v28 = vpop.eup %863 }
 0x22e   : > { %v475_v29 = vmul.f32 %v864_v28, %v856_v3  ;;  %822 = vmatmul.mubr.msk.bf16.vlgmr.msra.gmra.mrb[8].mxu0 %vm236_vm1, %v480_v27 }
 0x22f   : > { %832 = vmatpush3.bf16.msra.mxu0 %v581_v17  ;;  %833 = vmatprep.mubr.msk.bf16.mxu0 %vm878_vm0, %v877_v0 }
 0x230   : > { %v481_v30 = vpack.c.bf16 %v475_v29, %v475_v29 }
 0x231   : > { %v866_v31 = vpop.eup %865 }
 0x232   : > { %v477_v32 = vmul.f32 %v866_v31, %v858_v5  ;;  %828 = vmatmul.mubr.msk.bf16.vlgmr.msra.gmra.mrb[8].mxu1 %vm236_vm1, %v481_v30 }
 0x233   : > { %838 = vmatpush3.bf16.msra.mxu1 %v627_v20  ;;  %839 = vmatprep.mubr.msk.bf16.mxu1 %vm878_vm0, %v877_v0 }
 0x234   : > { %v482_v33 = vpack.c.bf16 %v477_v32, %v477_v32 }
 0x235   : > { %v868_v34 = vpop.eup %867 }
 0x236   : > { %v479_v35 = vmul.f32 %v868_v34, %v860_v7  ;;  %834 = vmatmul.mubr.msk.bf16.vlgmr.msra.gmra.mrb[12].mxu0 %vm236_vm1, %v482_v33 }
 0x238   : > { %v483_v36 = vpack.c.bf16 %v479_v35, %v479_v35 }
 0x23a   : > { %840 = vmatmul.mubr.msk.bf16.vlgmr.msra.gmra.mrb[12].mxu1 %vm236_vm1, %v483_v36 }
 0x301   : > { %v525_v37 = vpop.f32.mrb[8].mxu0 }
 0x302   : > { %669 = vst.msk [vmem:[%s210_s26] sm:$0xff] %vm236_vm1, %v525_v37  ;;  %v823_v38 = vpop.f32.mrb[9].mxu0 }
 0x303   : > { %v528_v39 = vpop.f32.mrb[10].mxu0 }
 0x304   : > { %v824_v40 = vpop.f32.mrb[11].mxu0 }
 0x305   : > { %v571_v41 = vpop.f32.mrb[8].mxu1 }
 0x306   : > { %670 = vst.msk [vmem:[%s210_s26 + $0x8] sm:$0xff] %vm236_vm1, %v571_v41  ;;  %v829_v0 = vpop.f32.mrb[9].mxu1 }
 0x307   : > { %v574_v42 = vpop.f32.mrb[10].mxu1 }
 0x308   : > { %v830_v43 = vpop.f32.mrb[11].mxu1 }
 0x309   : > { %v617_v44 = vpop.f32.mrb[12].mxu0 }
 0x30a   : > { %671 = vst.msk [vmem:[%s210_s26 + $0x10] sm:$0xff] %vm236_vm1, %v617_v44  ;;  %v835_v45 = vpop.f32.mrb[13].mxu0 }
 0x30b   : > { %v620_v46 = vpop.f32.mrb[14].mxu0 }
 0x30c   : > { %v836_v47 = vpop.f32.mrb[15].mxu0 }
 0x30d   : > { %v663_v48 = vpop.f32.mrb[12].mxu1 }
 0x30e   : > { %672 = vst.msk [vmem:[%s210_s26 + $0x18] sm:$0xff] %vm236_vm1, %v663_v48  ;;  %v841_v49 = vpop.f32.mrb[13].mxu1 }
 0x30f   : > { %v666_v50 = vpop.f32.mrb[14].mxu1 }
 0x310   : > { %v842_v51 = vpop.f32.mrb[15].mxu1 }
 0x311 PF: > { %s13_s12 = sadd.s32 1, %s875_s12  }
 0x312   : > { %p10_p4 = scmp.ge.s32.totalorder %s13_s12, 10  }
 0x314   :  { %12 = sbr.rel (!%p10_p4) target bundleno = 1 (0x1), region = 68 }

// kernel: forward.15
= control target key start
LH: loop header
LB: loop body
LE: loop exit
PB: predicated region body
PF: predicated region fallthrough
CT: control target
= control target key end

     0   :  { %vm22_vm0 = vcmask 261120   ;;  %v247_v1 = vmov 0.0   ;;  %s382_s1 = inlined_call_operand.vmem [shape: bf16[32,32], index: 1, kind: input, shape index: {}]   ;;  %s383_s0 = inlined_call_operand.vmem [shape: f32[64,32], index: 0, kind: input, shape index: {}]   ;;  %s384_s2 = inlined_call_operand.vmem [shape: f32[1,32], index: 2, kind: input, shape index: {}]   ;;  %s385_s3 = inlined_call_operand.vmem [shape: f32[64,32], index: 3, kind: input, shape index: {}]   ;;  %s386_s4 = inlined_call_operand.vmem [shape: f32[64,32], index: 4, kind: output, shape index: {}]  }
   0x1   :  { %v245_v0 = vld [vmem:[%s382_s1] sm:$0xff]   ;;  %25 = vst.msk [vmem:[#allocation2 + $0x10] sm:$0xff] %vm22_vm0, %v247_v1  ;;  %23 = vst.msk [vmem:[#allocation2] sm:$0xff] %vm22_vm0, %v247_v1  ;;  %v246_v2 = vld [vmem:[%s382_s1 + $0x8] sm:$0xff]  }
   0x2   :  { %24 = vst.msk [vmem:[#allocation2 + $0x8] sm:$0xff] %vm22_vm0, %v247_v1  ;;  %26 = vst.msk [vmem:[#allocation2 + $0x18] sm:$0xff] %vm22_vm0, %v247_v1  ;;  %228 = vmatprep.subr.bf16.mxu0 %v245_v0  ;;  %240 = vmatprep.subr.bf16.mxu1 %v245_v0  ;;  %v39_v3 = vld [vmem:[%s383_s0] sm:$0xff]  ;;  %v40_v4 = vld [vmem:[%s383_s0 + $0x8] sm:$0xff] }
   0x3   :  { %27 = vst.msk [vmem:[#allocation2 + $0x20] sm:$0xff] %vm22_vm0, %v247_v1  ;;  %28 = vst.msk [vmem:[#allocation2 + $0x28] sm:$0xff] %vm22_vm0, %v247_v1  ;;  %v43_v5 = vld [vmem:[%s383_s0 + $0x20] sm:$0xff]  ;;  %229 = vmatpush3.bf16.msra.mxu0 %v245_v0  ;;  %242 = vmatpush3.bf16.msra.mxu1 %v245_v0  ;;  %v47_v6 = vpack.c.bf16 %v40_v4, %v39_v3  ;;  %v44_v7 = vld [vmem:[%s383_s0 + $0x28] sm:$0xff] }
   0x4   :  { %29 = vst.msk [vmem:[#allocation2 + $0x30] sm:$0xff] %vm22_vm0, %v247_v1  ;;  %30 = vst.msk [vmem:[#allocation2 + $0x38] sm:$0xff] %vm22_vm0, %v247_v1  ;;  %v41_v8 = vld [vmem:[%s383_s0 + $0x10] sm:$0xff]  ;;  %v42_v9 = vld [vmem:[%s383_s0 + $0x18] sm:$0xff]  ;;  %230 = vmatprep.subr.bf16.mxu0 %v246_v2  ;;  %241 = vmatprep.subr.bf16.mxu1 %v246_v2  ;;  %v49_v10 = vpack.c.bf16 %v44_v7, %v43_v5 }
   0x5   :  { %v45_v11 = vld [vmem:[%s383_s0 + $0x30] sm:$0xff]  ;;  %v46_v12 = vld [vmem:[%s383_s0 + $0x38] sm:$0xff]  ;;  %232 = vmatprep.mubr.msk.bf16.mxu0 %vm22_vm0, %v47_v6  ;;  %v48_v13 = vpack.c.bf16 %v42_v9, %v41_v8  ;;  %v221_v39 = vld [vmem:[%s384_s2] ss:$0 sm:$0xff] }
   0x6   :  { %236 = vmatprep.mubr.msk.bf16.mxu1 %vm22_vm0, %v49_v10  ;;  %v50_v14 = vpack.c.bf16 %v46_v12, %v45_v11  ;;  %v189_v40 = vld [vmem:[%s385_s3 + $0x10] sm:$0xff]  ;;  %v187_v42 = vld [vmem:[%s385_s3] sm:$0xff]  ;;  %v190_v46 = vld [vmem:[%s385_s3 + $0x18] sm:$0xff] }
   0x7   :  { %231 = vmatpush3.bf16.msra.mxu0 %v246_v2  ;;  %243 = vmatpush3.bf16.msra.mxu1 %v246_v2  ;;  %v193_v41 = vld [vmem:[%s385_s3 + $0x30] sm:$0xff]  ;;  %v191_v43 = vld [vmem:[%s385_s3 + $0x20] sm:$0xff]  ;;  %v194_v51 = vld [vmem:[%s385_s3 + $0x38] sm:$0xff] }
   0x8   :  { %v33_v15 = vld [vmem:[#allocation2 + $0x10] sm:$0xff]  ;;  %v31_v17 = vld [vmem:[#allocation2] sm:$0xff]  ;;  %v188_v56 = vld [vmem:[%s385_s3 + $0x8] sm:$0xff] }
   0x9   :  { %v34_v21 = vld [vmem:[#allocation2 + $0x18] sm:$0xff]  ;;  %v32_v27 = vld [vmem:[#allocation2 + $0x8] sm:$0xff] }
   0xa   :  { %233 = vmatmul.mubr.msk.bf16.vlgmr.msra.gmra.mrb[0].mxu0 %vm22_vm0, %v48_v13  ;;  %237 = vmatmul.mubr.msk.bf16.vlgmr.msra.gmra.mrb[0].mxu1 %vm22_vm0, %v50_v14  ;;  %v35_v18 = vld [vmem:[#allocation2 + $0x20] sm:$0xff]  ;;  %v36_v28 = vld [vmem:[#allocation2 + $0x28] sm:$0xff] }
   0xb   :  { %v37_v16 = vld [vmem:[#allocation2 + $0x30] sm:$0xff]  ;;  %v38_v22 = vld [vmem:[#allocation2 + $0x38] sm:$0xff]  ;;  %v192_v63 = vld [vmem:[%s385_s3 + $0x28] sm:$0xff] }
  0xdd   :  { %v234_v19 = vpop.f32.mrb[0].mxu0  ;;  %v238_v20 = vpop.f32.mrb[0].mxu1 }
  0xde   :  { %v147_v23 = vadd.f32 %v234_v19, %v33_v15  ;;  %v151_v24 = vadd.f32 %v238_v20, %v37_v16  ;;  %v114_v25 = vpop.f32.mrb[1].mxu0  ;;  %v130_v26 = vpop.f32.mrb[1].mxu1 }
  0xdf   :  { %v145_v29 = vadd.f32 %v114_v25, %v31_v17  ;;  %v149_v30 = vadd.f32 %v130_v26, %v35_v18  ;;  %v235_v31 = vpop.f32.mrb[2].mxu0  ;;  %v239_v32 = vpop.f32.mrb[2].mxu1 }
  0xe0   :  { %155 = vst.msk [vmem:[#allocation2 + $0x10] sm:$0xff] %vm22_vm0, %v147_v23  ;;  %159 = vst.msk [vmem:[#allocation2 + $0x30] sm:$0xff] %vm22_vm0, %v151_v24  ;;  %v148_v33 = vadd.f32 %v235_v31, %v34_v21  ;;  %v152_v34 = vadd.f32 %v239_v32, %v38_v22  ;;  %v117_v35 = vpop.f32.mrb[3].mxu0  ;;  %v133_v36 = vpop.f32.mrb[3].mxu1 }
  0xe1   :  { %153 = vst.msk [vmem:[#allocation2] sm:$0xff] %vm22_vm0, %v145_v29  ;;  %157 = vst.msk [vmem:[#allocation2 + $0x20] sm:$0xff] %vm22_vm0, %v149_v30  ;;  %v146_v37 = vadd.f32 %v117_v35, %v32_v27  ;;  %v150_v38 = vadd.f32 %v133_v36, %v36_v28 }
  0xe2   :  { %156 = vst.msk [vmem:[#allocation2 + $0x18] sm:$0xff] %vm22_vm0, %v148_v33  ;;  %160 = vst.msk [vmem:[#allocation2 + $0x38] sm:$0xff] %vm22_vm0, %v152_v34 }
  0xe3   :  { %154 = vst.msk [vmem:[#allocation2 + $0x8] sm:$0xff] %vm22_vm0, %v146_v37  ;;  %158 = vst.msk [vmem:[#allocation2 + $0x28] sm:$0xff] %vm22_vm0, %v150_v38 }
  0xe7   :  { %v166_v44 = vld [vmem:[#allocation2 + $0x10] sm:$0xff] }
  0xe8   :  { %v170_v45 = vld [vmem:[#allocation2 + $0x30] sm:$0xff]  ;;  %v181_v47 = vadd.f32 %v221_v39, %v166_v44  ;;  %v164_v49 = vld [vmem:[#allocation2] sm:$0xff] }
  0xe9   :  { %v185_v48 = vadd.f32 %v221_v39, %v170_v45  ;;  %v168_v50 = vld [vmem:[#allocation2 + $0x20] sm:$0xff]  ;;  %v179_v52 = vadd.f32 %v221_v39, %v164_v49  ;;  %v167_v54 = vld [vmem:[#allocation2 + $0x18] sm:$0xff] }
  0xea   :  { %v183_v53 = vadd.f32 %v221_v39, %v168_v50  ;;  %v171_v55 = vld [vmem:[#allocation2 + $0x38] sm:$0xff]  ;;  %v197_v57 = vadd.f32 %v189_v40, %v181_v47  ;;  %v182_v59 = vadd.f32 %v221_v39, %v167_v54  ;;  %v165_v61 = vld [vmem:[#allocation2 + $0x8] sm:$0xff] }
  0xeb   :  { %v201_v58 = vadd.f32 %v193_v41, %v185_v48  ;;  %v186_v60 = vadd.f32 %v221_v39, %v171_v55  ;;  %v169_v62 = vld [vmem:[#allocation2 + $0x28] sm:$0xff]  ;;  %v195_v0 = vadd.f32 %v187_v42, %v179_v52  ;;  %v180_v2 = vadd.f32 %v221_v39, %v165_v61 }
  0xec   :  { %v199_v1 = vadd.f32 %v191_v43, %v183_v53  ;;  %v184_v3 = vadd.f32 %v221_v39, %v169_v62  ;;  %205 = vst.msk [vmem:[%s386_s4 + $0x10] sm:$0xff] %vm22_vm0, %v197_v57  ;;  %v198_v4 = vadd.f32 %v190_v46, %v182_v59 }
  0xed   :  { %209 = vst.msk [vmem:[%s386_s4 + $0x30] sm:$0xff] %vm22_vm0, %v201_v58  ;;  %v202_v5 = vadd.f32 %v194_v51, %v186_v60  ;;  %203 = vst.msk [vmem:[%s386_s4] sm:$0xff] %vm22_vm0, %v195_v0  ;;  %v196_v6 = vadd.f32 %v188_v56, %v180_v2 }
  0xee   :  { %207 = vst.msk [vmem:[%s386_s4 + $0x20] sm:$0xff] %vm22_vm0, %v199_v1  ;;  %v200_v7 = vadd.f32 %v192_v63, %v184_v3  ;;  %206 = vst.msk [vmem:[%s386_s4 + $0x18] sm:$0xff] %vm22_vm0, %v198_v4 }
  0xef   :  { %210 = vst.msk [vmem:[%s386_s4 + $0x38] sm:$0xff] %vm22_vm0, %v202_v5  ;;  %204 = vst.msk [vmem:[%s386_s4 + $0x8] sm:$0xff] %vm22_vm0, %v196_v6 }
  0xf0   :  { %208 = vst.msk [vmem:[%s386_s4 + $0x28] sm:$0xff] %vm22_vm0, %v200_v7 }

// kernel: forward.16
= control target key start
LH: loop header
LB: loop body
LE: loop exit
PB: predicated region body
PF: predicated region fallthrough
CT: control target
= control target key end

     0   :  { %vm29_vm0 = vcmask 261120   ;;  %s627_s0 = inlined_call_operand.vmem [shape: f32[64,32], index: 0, kind: input, shape index: {}]   ;;  %s628_s3 = inlined_call_operand.vmem [shape: bf16[32,128], index: 3, kind: input, shape index: {}]   ;;  %s629_s1 = inlined_call_operand.vmem [shape: f32[1,32], index: 1, kind: input, shape index: {}]   ;;  %s630_s2 = inlined_call_operand.vmem [shape: f32[1,32], index: 2, kind: input, shape index: {}]   ;;  %s631_s4 = inlined_call_operand.vmem [shape: f32[1,128], index: 4, kind: input, shape index: {}]   ;;  %s632_s5 = inlined_call_operand.vmem [shape: f32[64,128], index: 5, kind: output, shape index: {}]  }
   0x1   :  { %v21_v0 = vld [vmem:[%s627_s0] sm:$0xff]  ;;  %v22_v2 = vld [vmem:[%s627_s0 + $0x8] sm:$0xff]  ;;  %v23_v8 = vld [vmem:[%s627_s0 + $0x10] sm:$0xff] }
   0x2   :  { %v25_v1 = vld [vmem:[%s627_s0 + $0x20] sm:$0xff]  ;;  %v30_v3 = vsel %vm29_vm0, %v21_v0, 0.0  ;;  %v26_v5 = vld [vmem:[%s627_s0 + $0x28] sm:$0xff]  ;;  %v33_v6 = vsel %vm29_vm0, %v22_v2, 0.0  ;;  %v24_v9 = vld [vmem:[%s627_s0 + $0x18] sm:$0xff]  ;;  %v36_v10 = vsel %vm29_vm0, %v23_v8, 0.0 }
   0x3   :  { %v42_v4 = vsel %vm29_vm0, %v25_v1, 0.0  ;;  %31 = vadd.xlane.f32.xlu0 %v30_v3  ;;  %v45_v7 = vsel %vm29_vm0, %v26_v5, 0.0  ;;  %v39_v11 = vsel %vm29_vm0, %v24_v9, 0.0  ;;  %v27_v12 = vld [vmem:[%s627_s0 + $0x30] sm:$0xff]  ;;  %v28_v13 = vld [vmem:[%s627_s0 + $0x38] sm:$0xff]  ;;  %v384_v56 = vld [vmem:[%s628_s3] sm:$0xff]  }
   0x4   :  { %43 = vadd.xlane.f32.xlu1 %v42_v4  ;;  %v48_v14 = vsel %vm29_vm0, %v27_v12, 0.0  ;;  %v51_v15 = vsel %vm29_vm0, %v28_v13, 0.0  ;;  %368 = vmatprep.subr.bf16.mxu0 %v384_v56  ;;  %v385_v57 = vld [vmem:[%s628_s3 + $0x8] sm:$0xff]  }
   0x5   :  { %380 = vmatprep.subr.bf16.mxu1 %v384_v56  ;;  %369 = vmatpush3.bf16.msra.mxu0 %v384_v56 }
   0x6   :  { %382 = vmatpush3.bf16.msra.mxu1 %v384_v56  ;;  %370 = vmatprep.subr.bf16.mxu0 %v385_v57 }
   0x7   :  { %34 = vadd.xlane.f32.xlu0 %v33_v6  ;;  %381 = vmatprep.subr.bf16.mxu1 %v385_v57 }
   0x8   :  { %46 = vadd.xlane.f32.xlu1 %v45_v7 }
   0x9   :  { %371 = vmatpush3.bf16.msra.mxu0 %v385_v57 }
   0xa   :  { %383 = vmatpush3.bf16.msra.mxu1 %v385_v57 }
   0xb   :  { %37 = vadd.xlane.f32.xlu0 %v36_v10 }
   0xc   :  { %40 = vadd.xlane.f32.xlu1 %v39_v11 }
   0xf   :  { %49 = vadd.xlane.f32.xlu0 %v48_v14 }
  0x10   :  { %52 = vadd.xlane.f32.xlu1 %v51_v15 }
  0x90   :  { %v32_v16 = vpop.xlane.xlu0 %31 }
  0x91   :  { %v44_v17 = vpop.xlane.xlu1 %43  ;;  %v55_v18 = vmul.f32 0.03125, %v32_v16 }
  0x92   :  { %v59_v19 = vmul.f32 0.03125, %v44_v17 }
  0x93   :  { %v480_v20 = vsub.f32 %v21_v0, %v55_v18 }
  0x94   :  { %v482_v21 = vsub.f32 %v25_v1, %v59_v19  ;;  %v35_v22 = vpop.xlane.xlu0 %34  ;;  %v353_v19 = vld [vmem:[%s629_s1] ss:$0 sm:$0xff] }
  0x95   :  { %v47_v23 = vpop.xlane.xlu1 %46  ;;  %v56_v24 = vmul.f32 0.03125, %v35_v22  ;;  %v71_v26 = vmul.f32 %v480_v20, %v480_v20 }
  0x96   :  { %v60_v25 = vmul.f32 0.03125, %v47_v23  ;;  %v75_v27 = vmul.f32 %v482_v21, %v482_v21 }
  0x97   :  { %v488_v28 = vsub.f32 %v22_v2, %v56_v24  ;;  %v79_v30 = vsel %vm29_vm0, %v71_v26, 0.0 }
  0x98   :  { %v490_v29 = vsub.f32 %v26_v5, %v60_v25  ;;  %80 = vadd.xlane.f32.xlu0 %v79_v30  ;;  %v38_v31 = vpop.xlane.xlu0 %37  ;;  %v91_v33 = vsel %vm29_vm0, %v75_v27, 0.0  ;;  %v354_v27 = vld [vmem:[%s630_s2] ss:$0 sm:$0xff] }
  0x99   :  { %v41_v32 = vpop.xlane.xlu1 %40  ;;  %v57_v34 = vmul.f32 0.03125, %v38_v31  ;;  %v72_v36 = vmul.f32 %v488_v28, %v488_v28 }
  0x9a   :  { %v58_v35 = vmul.f32 0.03125, %v41_v32  ;;  %v76_v37 = vmul.f32 %v490_v29, %v490_v29 }
  0x9b   :  { %v498_v38 = vsub.f32 %v23_v8, %v57_v34  ;;  %v82_v40 = vsel %vm29_vm0, %v72_v36, 0.0 }
  0x9c   :  { %v500_v39 = vsub.f32 %v24_v9, %v58_v35  ;;  %92 = vadd.xlane.f32.xlu0 %v91_v33  ;;  %83 = vadd.xlane.f32.xlu1 %v82_v40  ;;  %v50_v41 = vpop.xlane.xlu0 %49  ;;  %v94_v43 = vsel %vm29_vm0, %v76_v37, 0.0 }
  0x9d   :  { %v53_v42 = vpop.xlane.xlu1 %52  ;;  %v61_v44 = vmul.f32 0.03125, %v50_v41  ;;  %v73_v46 = vmul.f32 %v498_v38, %v498_v38 }
  0x9e   :  { %v62_v45 = vmul.f32 0.03125, %v53_v42  ;;  %v74_v47 = vmul.f32 %v500_v39, %v500_v39 }
  0x9f   :  { %v508_v48 = vsub.f32 %v27_v12, %v61_v44  ;;  %v85_v50 = vsel %vm29_vm0, %v73_v46, 0.0 }
  0xa0   :  { %v510_v49 = vsub.f32 %v28_v13, %v62_v45  ;;  %95 = vadd.xlane.f32.xlu1 %v94_v43  ;;  %86 = vadd.xlane.f32.xlu0 %v85_v50  ;;  %v88_v51 = vsel %vm29_vm0, %v74_v47, 0.0 }
  0xa1   :  { %v77_v52 = vmul.f32 %v508_v48, %v508_v48 }
  0xa2   :  { %v78_v53 = vmul.f32 %v510_v49, %v510_v49 }
  0xa3   :  { %v97_v54 = vsel %vm29_vm0, %v77_v52, 0.0 }
  0xa4   :  { %89 = vadd.xlane.f32.xlu1 %v88_v51  ;;  %98 = vadd.xlane.f32.xlu0 %v97_v54  ;;  %v100_v55 = vsel %vm29_vm0, %v78_v53, 0.0 }
  0xa8   :  { %101 = vadd.xlane.f32.xlu1 %v100_v55 }
 0x125   :  { %v81_v58 = vpop.xlane.xlu0 %80 }
 0x126   :  { %v103_v59 = vmul.f32 0.03125, %v81_v58 }
 0x128   :  { %v111_v60 = vadd.f32 1e-05, %v103_v59 }
 0x129   :  { %v84_v61 = vpop.xlane.xlu1 %83  ;;  %v93_v62 = vpop.xlane.xlu0 %92 }
 0x12a   :  { %386 = vrsqrt.f32 %v111_v60  ;;  %v104_v63 = vmul.f32 0.03125, %v84_v61  ;;  %v107_v0 = vmul.f32 0.03125, %v93_v62 }
 0x12c   :  { %v112_v1 = vadd.f32 1e-05, %v104_v63  ;;  %v115_v2 = vadd.f32 1e-05, %v107_v0 }
 0x12d   :  { %v96_v3 = vpop.xlane.xlu1 %95  ;;  %v87_v4 = vpop.xlane.xlu0 %86 }
 0x12e   :  { %388 = vrsqrt.f32 %v112_v1  ;;  %v108_v5 = vmul.f32 0.03125, %v96_v3  ;;  %v105_v6 = vmul.f32 0.03125, %v87_v4 }
 0x12f   :  { %390 = vrsqrt.f32 %v115_v2 }
 0x130   :  { %v116_v7 = vadd.f32 1e-05, %v108_v5  ;;  %v113_v8 = vadd.f32 1e-05, %v105_v6 }
 0x131   :  { %v90_v9 = vpop.xlane.xlu1 %89  ;;  %v99_v10 = vpop.xlane.xlu0 %98 }
 0x132   :  { %392 = vrsqrt.f32 %v116_v7  ;;  %v106_v11 = vmul.f32 0.03125, %v90_v9  ;;  %v109_v12 = vmul.f32 0.03125, %v99_v10 }
 0x133   :  { %394 = vrsqrt.f32 %v113_v8 }
 0x134   :  { %v387_v13 = vpop.eup %386  ;;  %v114_v14 = vadd.f32 1e-05, %v106_v11  ;;  %v117_v15 = vadd.f32 1e-05, %v109_v12 }
 0x135   :  { %v102_v16 = vpop.xlane.xlu1 %101  ;;  %v127_v17 = vmul.f32 %v387_v13, %v480_v20 }
 0x136   :  { %396 = vrsqrt.f32 %v114_v14  ;;  %v110_v18 = vmul.f32 0.03125, %v102_v16 }
 0x137   :  { %398 = vrsqrt.f32 %v117_v15  ;;  %v142_v26 = vmul.f32 %v353_v19, %v127_v17 }
 0x138   :  { %v389_v22 = vpop.eup %388  ;;  %v118_v23 = vadd.f32 1e-05, %v110_v18 }
 0x139   :  { %v391_v24 = vpop.eup %390  ;;  %v128_v25 = vmul.f32 %v389_v22, %v488_v28  ;;  %v157_v33 = vadd.f32 %v354_v27, %v142_v26 }
 0x13a   :  { %400 = vrsqrt.f32 %v118_v23  ;;  %v131_v20 = vmul.f32 %v391_v24, %v482_v21 }
 0x13b   :  { %v143_v30 = vmul.f32 %v353_v19, %v128_v25 }
 0x13c   :  { %v393_v31 = vpop.eup %392  ;;  %v146_v36 = vmul.f32 %v353_v19, %v131_v20 }
 0x13d   :  { %v395_v32 = vpop.eup %394  ;;  %v158_v34 = vadd.f32 %v354_v27, %v143_v30  ;;  %v132_v35 = vmul.f32 %v393_v31, %v490_v29 }
 0x13e   :  { %v129_v37 = vmul.f32 %v395_v32, %v498_v38  ;;  %v161_v44 = vadd.f32 %v354_v27, %v146_v36 }
 0x13f   :  { %v165_v40 = vpack.c.bf16 %v158_v34, %v157_v33  ;;  %v147_v28 = vmul.f32 %v353_v19, %v132_v35 }
 0x140   :  { %v397_v41 = vpop.eup %396  ;;  %v144_v45 = vmul.f32 %v353_v19, %v129_v37 }
 0x141   :  { %v399_v42 = vpop.eup %398  ;;  %v130_v43 = vmul.f32 %v397_v41, %v500_v39  ;;  %372 = vmatprep.mubr.msk.bf16.mxu0 %vm29_vm0, %v165_v40  ;;  %v162_v21 = vadd.f32 %v354_v27, %v147_v28 }
 0x142   :  { %v133_v46 = vmul.f32 %v399_v42, %v508_v48  ;;  %v159_v38 = vadd.f32 %v354_v27, %v144_v45  ;;  %v355_v48 = vld [vmem:[%s631_s4] ss:$0 sm:$0xff] }
 0x143   :  { %v167_v47 = vpack.c.bf16 %v162_v21, %v161_v44  ;;  %v145_v50 = vmul.f32 %v353_v19, %v130_v43 }
 0x144   :  { %v401_v51 = vpop.eup %400  ;;  %v148_v53 = vmul.f32 %v353_v19, %v133_v46 }
 0x145   :  { %v134_v29 = vmul.f32 %v401_v51, %v510_v49  ;;  %376 = vmatprep.mubr.msk.bf16.mxu1 %vm29_vm0, %v167_v47  ;;  %v160_v52 = vadd.f32 %v354_v27, %v145_v50 }
 0x146   :  { %v163_v39 = vadd.f32 %v354_v27, %v148_v53 }
 0x147   :  { %v166_v54 = vpack.c.bf16 %v160_v52, %v159_v38  ;;  %v149_v55 = vmul.f32 %v353_v19, %v134_v29 }
 0x149   :  { %373 = vmatmul.mubr.msk.bf16.vlgmr.msra.gmra.mrb[0].mxu0 %vm29_vm0, %v166_v54  ;;  %v164_v56 = vadd.f32 %v354_v27, %v149_v55 }
 0x14b   :  { %v168_v57 = vpack.c.bf16 %v164_v56, %v163_v39 }
 0x14d   :  { %377 = vmatmul.mubr.msk.bf16.vlgmr.msra.gmra.mrb[0].mxu1 %vm29_vm0, %v168_v57 }
 0x21c   :  { %v374_v58 = vpop.f32.mrb[0].mxu0 }
 0x21d   :  { %v547_v49 = vadd.f32 %v374_v58, %v355_v48  ;;  %v238_v59 = vpop.f32.mrb[1].mxu0 }
 0x21e   :  { %v549_v60 = vadd.f32 %v355_v48, %v238_v59  ;;  %v375_v61 = vpop.f32.mrb[2].mxu0 }
 0x21f   :  { %v279_v62 = vmul.f32 %v547_v49, %v547_v49  ;;  %v553_v63 = vadd.f32 %v375_v61, %v355_v48  ;;  %v241_v0 = vpop.f32.mrb[3].mxu0  ;;  %v271_v54 = vmul.f32 0.5, %v547_v49 }
 0x220   :  { %v277_v1 = vmul.f32 %v549_v60, %v549_v60  ;;  %v557_v2 = vadd.f32 %v355_v48, %v241_v0  ;;  %v378_v3 = vpop.f32.mrb[0].mxu1  ;;  %v269_v56 = vmul.f32 0.5, %v549_v60 }
 0x221   :  { %v287_v4 = vmul.f32 %v279_v62, %v547_v49  ;;  %v280_v5 = vmul.f32 %v553_v63, %v553_v63  ;;  %v562_v6 = vadd.f32 %v378_v3, %v355_v48  ;;  %v254_v7 = vpop.f32.mrb[1].mxu1  ;;  %v272_v59 = vmul.f32 0.5, %v553_v63 }
 0x222   :  { %v285_v8 = vmul.f32 %v277_v1, %v549_v60  ;;  %v278_v9 = vmul.f32 %v557_v2, %v557_v2  ;;  %v567_v10 = vadd.f32 %v355_v48, %v254_v7  ;;  %v379_v11 = vpop.f32.mrb[2].mxu1  ;;  %v270_v1 = vmul.f32 0.5, %v557_v2 }
 0x223   :  { %v295_v12 = vmul.f32 0.044715, %v287_v4  ;;  %v288_v13 = vmul.f32 %v280_v5, %v553_v63  ;;  %v283_v14 = vmul.f32 %v562_v6, %v562_v6  ;;  %v257_v15 = vpop.f32.mrb[3].mxu1  ;;  %v577_v24 = vadd.f32 %v379_v11, %v355_v48 }
 0x224   :  { %v293_v16 = vmul.f32 0.044715, %v285_v8  ;;  %v286_v17 = vmul.f32 %v278_v9, %v557_v2  ;;  %v281_v18 = vmul.f32 %v567_v10, %v567_v10  ;;  %v582_v32 = vadd.f32 %v355_v48, %v257_v15 }
 0x225   :  { %v303_v19 = vadd.f32 %v295_v12, %v547_v49  ;;  %v296_v22 = vmul.f32 0.044715, %v288_v13  ;;  %v291_v23 = vmul.f32 %v283_v14, %v562_v6  ;;  %v284_v36 = vmul.f32 %v577_v24, %v577_v24 }
 0x226   :  { %v301_v25 = vadd.f32 %v293_v16, %v549_v60  ;;  %v294_v26 = vmul.f32 0.044715, %v286_v17  ;;  %v289_v27 = vmul.f32 %v281_v18, %v567_v10  ;;  %v282_v44 = vmul.f32 %v582_v32, %v582_v32 }
 0x227   :  { %v311_v20 = vmul.f32 0.7978846, %v303_v19  ;;  %v304_v30 = vadd.f32 %v296_v22, %v553_v63  ;;  %v299_v31 = vmul.f32 0.044715, %v291_v23  ;;  %v292_v42 = vmul.f32 %v284_v36, %v577_v24 }
 0x228   :  { %v309_v33 = vmul.f32 0.7978846, %v301_v25  ;;  %v302_v34 = vadd.f32 %v294_v26, %v557_v2  ;;  %v297_v35 = vmul.f32 0.044715, %v289_v27  ;;  %v290_v46 = vmul.f32 %v282_v44, %v582_v32 }
 0x229   :  { %402 = vtanh.f32 %v311_v20  ;;  %v312_v37 = vmul.f32 0.7978846, %v304_v30  ;;  %v307_v40 = vadd.f32 %v299_v31, %v562_v6  ;;  %v300_v45 = vmul.f32 0.044715, %v292_v42 }
 0x22a   :  { %404 = vtanh.f32 %v309_v33  ;;  %v310_v28 = vmul.f32 0.7978846, %v302_v34  ;;  %v305_v41 = vadd.f32 %v297_v35, %v567_v10  ;;  %v298_v50 = vmul.f32 0.044715, %v290_v46 }
 0x22b   :  { %406 = vtanh.f32 %v312_v37  ;;  %v315_v43 = vmul.f32 0.7978846, %v307_v40  ;;  %v308_v47 = vadd.f32 %v300_v45, %v577_v24  ;;  %v275_v60 = vmul.f32 0.5, %v562_v6 }
 0x22c   :  { %408 = vtanh.f32 %v310_v28  ;;  %v313_v21 = vmul.f32 0.7978846, %v305_v41  ;;  %v306_v29 = vadd.f32 %v298_v50, %v582_v32  ;;  %v273_v7 = vmul.f32 0.5, %v567_v10 }
 0x22d   :  { %410 = vtanh.f32 %v315_v43  ;;  %v316_v51 = vmul.f32 0.7978846, %v308_v47  ;;  %v276_v10 = vmul.f32 0.5, %v577_v24  ;;  %v274_v14 = vmul.f32 0.5, %v582_v32 }
 0x22e   :  { %412 = vtanh.f32 %v313_v21  ;;  %v314_v52 = vmul.f32 0.7978846, %v306_v29 }
 0x22f   :  { %414 = vtanh.f32 %v316_v51 }
 0x230   :  { %416 = vtanh.f32 %v314_v52 }
 0x233   :  { %v403_v38 = vpop.eup %402 }
 0x234   :  { %v405_v53 = vpop.eup %404  ;;  %v327_v55 = vadd.f32 1.0, %v403_v38 }
 0x235   :  { %v407_v39 = vpop.eup %406  ;;  %v325_v57 = vadd.f32 1.0, %v405_v53 }
 0x236   :  { %v409_v48 = vpop.eup %408  ;;  %v335_v58 = vmul.f32 %v327_v55, %v271_v54  ;;  %v328_v61 = vadd.f32 1.0, %v407_v39 }
 0x237   :  { %v411_v62 = vpop.eup %410  ;;  %v333_v0 = vmul.f32 %v325_v57, %v269_v56  ;;  %v326_v3 = vadd.f32 1.0, %v409_v48 }
 0x238   :  { %v413_v4 = vpop.eup %412  ;;  %343 = vst [vmem:[%s632_s5 + $0x10] sm:$0xff] %v335_v58  ;;  %v336_v49 = vmul.f32 %v328_v61, %v272_v59  ;;  %v331_v5 = vadd.f32 1.0, %v411_v62 }
 0x239   :  { %341 = vst [vmem:[%s632_s5] sm:$0xff] %v333_v0  ;;  %v334_v63 = vmul.f32 %v326_v3, %v270_v1  ;;  %v329_v8 = vadd.f32 1.0, %v413_v4  ;;  %v415_v6 = vpop.eup %414 }
 0x23a   :  { %344 = vst [vmem:[%s632_s5 + $0x18] sm:$0xff] %v336_v49  ;;  %v339_v2 = vmul.f32 %v331_v5, %v275_v60  ;;  %v332_v11 = vadd.f32 1.0, %v415_v6  ;;  %v417_v12 = vpop.eup %416 }
 0x23b   :  { %342 = vst [vmem:[%s632_s5 + $0x8] sm:$0xff] %v334_v63  ;;  %v337_v9 = vmul.f32 %v329_v8, %v273_v7  ;;  %v330_v15 = vadd.f32 1.0, %v417_v12 }
 0x23c   :  { %347 = vst [vmem:[%s632_s5 + $0x30] sm:$0xff] %v339_v2  ;;  %v340_v13 = vmul.f32 %v332_v11, %v276_v10 }
 0x23d   :  { %345 = vst [vmem:[%s632_s5 + $0x20] sm:$0xff] %v337_v9  ;;  %v338_v16 = vmul.f32 %v330_v15, %v274_v14 }
 0x23e   :  { %348 = vst [vmem:[%s632_s5 + $0x38] sm:$0xff] %v340_v13 }
 0x23f   :  { %346 = vst [vmem:[%s632_s5 + $0x28] sm:$0xff] %v338_v16 }

// kernel: forward.17
= control target key start
LH: loop header
LB: loop body
LE: loop exit
PB: predicated region body
PF: predicated region fallthrough
CT: control target
= control target key end

     0   :  { %vm22_vm0 = vcmask 261120   ;;  %v321_v1 = vmov 0.0   ;;  %s470_s1 = inlined_call_operand.vmem [shape: bf16[128,32], index: 1, kind: input, shape index: {}]   ;;  %s471_s0 = inlined_call_operand.vmem [shape: f32[64,128], index: 0, kind: input, shape index: {}]   ;;  %s472_s2 = inlined_call_operand.vmem [shape: f32[1,32], index: 2, kind: input, shape index: {}]   ;;  %s473_s3 = inlined_call_operand.vmem [shape: f32[64,32], index: 3, kind: input, shape index: {}]   ;;  %s474_s4 = inlined_call_operand.vmem [shape: f32[64,32], index: 4, kind: output, shape index: {}]  }
   0x1   :  { %v313_v0 = vld [vmem:[%s470_s1] sm:$0xff]   ;;  %25 = vst.msk [vmem:[#allocation2 + $0x10] sm:$0xff] %vm22_vm0, %v321_v1  ;;  %23 = vst.msk [vmem:[#allocation2] sm:$0xff] %vm22_vm0, %v321_v1  ;;  %v314_v2 = vld [vmem:[%s470_s1 + $0x8] sm:$0xff]  }
   0x2   :  { %24 = vst.msk [vmem:[#allocation2 + $0x8] sm:$0xff] %vm22_vm0, %v321_v1  ;;  %26 = vst.msk [vmem:[#allocation2 + $0x18] sm:$0xff] %vm22_vm0, %v321_v1  ;;  %272 = vmatprep.subr.bf16.mxu0 %v313_v0  ;;  %296 = vmatprep.subr.bf16.mxu1 %v313_v0  ;;  %v315_v3 = vld [vmem:[%s470_s1 + $0x10] sm:$0xff]   ;;  %v316_v4 = vld [vmem:[%s470_s1 + $0x18] sm:$0xff]  }
   0x3   :  { %27 = vst.msk [vmem:[#allocation2 + $0x20] sm:$0xff] %vm22_vm0, %v321_v1  ;;  %28 = vst.msk [vmem:[#allocation2 + $0x28] sm:$0xff] %vm22_vm0, %v321_v1  ;;  %273 = vmatpush3.bf16.msra.mxu0 %v313_v0  ;;  %304 = vmatpush3.bf16.msra.mxu1 %v313_v0  ;;  %v39_v5 = vld [vmem:[%s471_s0] sm:$0xff]  ;;  %v40_v6 = vld [vmem:[%s471_s0 + $0x8] sm:$0xff] }
   0x4   :  { %29 = vst.msk [vmem:[#allocation2 + $0x30] sm:$0xff] %vm22_vm0, %v321_v1  ;;  %30 = vst.msk [vmem:[#allocation2 + $0x38] sm:$0xff] %vm22_vm0, %v321_v1  ;;  %274 = vmatprep.subr.bf16.mxu0 %v314_v2  ;;  %297 = vmatprep.subr.bf16.mxu1 %v314_v2  ;;  %v43_v7 = vld [vmem:[%s471_s0 + $0x20] sm:$0xff]  ;;  %v47_v8 = vpack.c.bf16 %v40_v6, %v39_v5  ;;  %v44_v9 = vld [vmem:[%s471_s0 + $0x28] sm:$0xff] }
   0x5   :  { %v49_v10 = vpack.c.bf16 %v44_v9, %v43_v7  ;;  %v317_v11 = vld [vmem:[%s470_s1 + $0x20] sm:$0xff]   ;;  %v318_v12 = vld [vmem:[%s470_s1 + $0x28] sm:$0xff]   ;;  %v319_v13 = vld [vmem:[%s470_s1 + $0x30] sm:$0xff]  }
   0x6   :  { %288 = vmatprep.mubr.bf16.mxu0 %v47_v8  ;;  %v320_v14 = vld [vmem:[%s470_s1 + $0x38] sm:$0xff]   ;;  %v41_v15 = vld [vmem:[%s471_s0 + $0x10] sm:$0xff]  ;;  %v259_v45 = vld [vmem:[%s472_s2] ss:$0 sm:$0xff] }
   0x7   :  { %275 = vmatpush3.bf16.msra.mxu0 %v314_v2  ;;  %305 = vmatpush3.bf16.msra.mxu1 %v314_v2  ;;  %v42_v16 = vld [vmem:[%s471_s0 + $0x18] sm:$0xff]  ;;  %v45_v17 = vld [vmem:[%s471_s0 + $0x30] sm:$0xff]  ;;  %v223_v48 = vld [vmem:[%s473_s3] sm:$0xff] }
   0x8   :  { %276 = vmatprep.subr.bf16.mxu0 %v315_v3  ;;  %298 = vmatprep.subr.bf16.mxu1 %v315_v3  ;;  %v46_v18 = vld [vmem:[%s471_s0 + $0x38] sm:$0xff]  ;;  %v48_v19 = vpack.c.bf16 %v42_v16, %v41_v15  ;;  %v33_v21 = vld [vmem:[#allocation2 + $0x10] sm:$0xff]  ;;  %v31_v23 = vld [vmem:[#allocation2] sm:$0xff] }
   0x9   :  { %292 = vmatprep.mubr.bf16.mxu1 %v49_v10  ;;  %v50_v20 = vpack.c.bf16 %v46_v18, %v45_v17  ;;  %v34_v27 = vld [vmem:[#allocation2 + $0x18] sm:$0xff]  ;;  %v32_v33 = vld [vmem:[#allocation2 + $0x8] sm:$0xff]  ;;  %v225_v46 = vld [vmem:[%s473_s3 + $0x10] sm:$0xff] }
   0xa   :  { %v35_v24 = vld [vmem:[#allocation2 + $0x20] sm:$0xff]  ;;  %v36_v34 = vld [vmem:[#allocation2 + $0x28] sm:$0xff]  ;;  %v229_v47 = vld [vmem:[%s473_s3 + $0x30] sm:$0xff] }
   0xb   :  { %277 = vmatpush3.bf16.msra.mxu0 %v315_v3  ;;  %306 = vmatpush3.bf16.msra.mxu1 %v315_v3  ;;  %v37_v22 = vld [vmem:[#allocation2 + $0x30] sm:$0xff]  ;;  %v38_v28 = vld [vmem:[#allocation2 + $0x38] sm:$0xff]  ;;  %v227_v49 = vld [vmem:[%s473_s3 + $0x20] sm:$0xff] }
   0xc   :  { %278 = vmatprep.subr.bf16.mxu0 %v316_v4  ;;  %299 = vmatprep.subr.bf16.mxu1 %v316_v4  ;;  %v226_v52 = vld [vmem:[%s473_s3 + $0x18] sm:$0xff]  ;;  %v224_v62 = vld [vmem:[%s473_s3 + $0x8] sm:$0xff] }
   0xd   :  { %v230_v57 = vld [vmem:[%s473_s3 + $0x38] sm:$0xff]  ;;  %v228_v5 = vld [vmem:[%s473_s3 + $0x28] sm:$0xff] }
   0xf   :  { %279 = vmatpush3.bf16.msra.mxu0 %v316_v4  ;;  %307 = vmatpush3.bf16.msra.mxu1 %v316_v4 }
  0x10   :  { %280 = vmatprep.subr.bf16.mxu0 %v317_v11  ;;  %300 = vmatprep.subr.bf16.mxu1 %v317_v11 }
  0x13   :  { %281 = vmatpush3.bf16.msra.mxu0 %v317_v11  ;;  %308 = vmatpush3.bf16.msra.mxu1 %v317_v11 }
  0x14   :  { %282 = vmatprep.subr.bf16.mxu0 %v318_v12  ;;  %301 = vmatprep.subr.bf16.mxu1 %v318_v12 }
  0x17   :  { %283 = vmatpush3.bf16.msra.mxu0 %v318_v12  ;;  %309 = vmatpush3.bf16.msra.mxu1 %v318_v12 }
  0x18   :  { %284 = vmatprep.subr.bf16.mxu0 %v319_v13  ;;  %302 = vmatprep.subr.bf16.mxu1 %v319_v13 }
  0x1b   :  { %285 = vmatpush3.bf16.msra.mxu0 %v319_v13  ;;  %310 = vmatpush3.bf16.msra.mxu1 %v319_v13 }
  0x1c   :  { %286 = vmatprep.subr.bf16.mxu0 %v320_v14  ;;  %303 = vmatprep.subr.bf16.mxu1 %v320_v14 }
  0x1f   :  { %287 = vmatpush3.bf16.msra.mxu0 %v320_v14  ;;  %311 = vmatpush3.bf16.msra.mxu1 %v320_v14 }
  0x22   :  { %289 = vmatmul.mubr.bf16.vlgmr.msra.gmra.mrb[0].mxu0 %v48_v19  ;;  %293 = vmatmul.mubr.bf16.vlgmr.msra.gmra.mrb[0].mxu1 %v50_v20 }
  0xf5   :  { %v290_v25 = vpop.f32.mrb[0].mxu0  ;;  %v294_v26 = vpop.f32.mrb[0].mxu1 }
  0xf6   :  { %v182_v29 = vadd.f32 %v290_v25, %v33_v21  ;;  %v186_v30 = vadd.f32 %v294_v26, %v37_v22  ;;  %v149_v31 = vpop.f32.mrb[1].mxu0  ;;  %v165_v32 = vpop.f32.mrb[1].mxu1 }
  0xf7   :  { %v180_v35 = vadd.f32 %v149_v31, %v31_v23  ;;  %v184_v36 = vadd.f32 %v165_v32, %v35_v24  ;;  %v291_v37 = vpop.f32.mrb[2].mxu0  ;;  %v295_v38 = vpop.f32.mrb[2].mxu1 }
  0xf8   :  { %191 = vst.msk [vmem:[#allocation2 + $0x10] sm:$0xff] %vm22_vm0, %v182_v29  ;;  %195 = vst.msk [vmem:[#allocation2 + $0x30] sm:$0xff] %vm22_vm0, %v186_v30  ;;  %v183_v39 = vadd.f32 %v291_v37, %v34_v27  ;;  %v187_v40 = vadd.f32 %v295_v38, %v38_v28  ;;  %v152_v41 = vpop.f32.mrb[3].mxu0  ;;  %v168_v42 = vpop.f32.mrb[3].mxu1 }
  0xf9   :  { %189 = vst.msk [vmem:[#allocation2] sm:$0xff] %vm22_vm0, %v180_v35  ;;  %193 = vst.msk [vmem:[#allocation2 + $0x20] sm:$0xff] %vm22_vm0, %v184_v36  ;;  %v181_v43 = vadd.f32 %v152_v41, %v32_v33  ;;  %v185_v44 = vadd.f32 %v168_v42, %v36_v34 }
  0xfa   :  { %192 = vst.msk [vmem:[#allocation2 + $0x18] sm:$0xff] %vm22_vm0, %v183_v39  ;;  %196 = vst.msk [vmem:[#allocation2 + $0x38] sm:$0xff] %vm22_vm0, %v187_v40 }
  0xfb   :  { %190 = vst.msk [vmem:[#allocation2 + $0x8] sm:$0xff] %vm22_vm0, %v181_v43  ;;  %194 = vst.msk [vmem:[#allocation2 + $0x28] sm:$0xff] %vm22_vm0, %v185_v44 }
  0xff   :  { %v202_v50 = vld [vmem:[#allocation2 + $0x10] sm:$0xff] }
 0x100   :  { %v206_v51 = vld [vmem:[#allocation2 + $0x30] sm:$0xff]  ;;  %v217_v53 = vadd.f32 %v259_v45, %v202_v50  ;;  %v200_v55 = vld [vmem:[#allocation2] sm:$0xff] }
 0x101   :  { %v221_v54 = vadd.f32 %v259_v45, %v206_v51  ;;  %v204_v56 = vld [vmem:[#allocation2 + $0x20] sm:$0xff]  ;;  %v215_v58 = vadd.f32 %v259_v45, %v200_v55  ;;  %v203_v60 = vld [vmem:[#allocation2 + $0x18] sm:$0xff] }
 0x102   :  { %v219_v59 = vadd.f32 %v259_v45, %v204_v56  ;;  %v207_v61 = vld [vmem:[#allocation2 + $0x38] sm:$0xff]  ;;  %v233_v63 = vadd.f32 %v225_v46, %v217_v53  ;;  %v218_v1 = vadd.f32 %v259_v45, %v203_v60  ;;  %v201_v3 = vld [vmem:[#allocation2 + $0x8] sm:$0xff] }
 0x103   :  { %v237_v0 = vadd.f32 %v229_v47, %v221_v54  ;;  %v222_v2 = vadd.f32 %v259_v45, %v207_v61  ;;  %v205_v4 = vld [vmem:[#allocation2 + $0x28] sm:$0xff]  ;;  %v231_v6 = vadd.f32 %v223_v48, %v215_v58  ;;  %v216_v8 = vadd.f32 %v259_v45, %v201_v3 }
 0x104   :  { %v235_v7 = vadd.f32 %v227_v49, %v219_v59  ;;  %v220_v9 = vadd.f32 %v259_v45, %v205_v4  ;;  %241 = vst.msk [vmem:[%s474_s4 + $0x10] sm:$0xff] %vm22_vm0, %v233_v63  ;;  %v234_v10 = vadd.f32 %v226_v52, %v218_v1 }
 0x105   :  { %245 = vst.msk [vmem:[%s474_s4 + $0x30] sm:$0xff] %vm22_vm0, %v237_v0  ;;  %v238_v11 = vadd.f32 %v230_v57, %v222_v2  ;;  %239 = vst.msk [vmem:[%s474_s4] sm:$0xff] %vm22_vm0, %v231_v6  ;;  %v232_v12 = vadd.f32 %v224_v62, %v216_v8 }
 0x106   :  { %243 = vst.msk [vmem:[%s474_s4 + $0x20] sm:$0xff] %vm22_vm0, %v235_v7  ;;  %v236_v13 = vadd.f32 %v228_v5, %v220_v9  ;;  %242 = vst.msk [vmem:[%s474_s4 + $0x18] sm:$0xff] %vm22_vm0, %v234_v10 }
 0x107   :  { %246 = vst.msk [vmem:[%s474_s4 + $0x38] sm:$0xff] %vm22_vm0, %v238_v11  ;;  %240 = vst.msk [vmem:[%s474_s4 + $0x8] sm:$0xff] %vm22_vm0, %v232_v12 }
 0x108   :  { %244 = vst.msk [vmem:[%s474_s4 + $0x28] sm:$0xff] %vm22_vm0, %v236_v13 }

// kernel: forward.23
= control target key start
LH: loop header
LB: loop body
LE: loop exit
PB: predicated region body
PF: predicated region fallthrough
CT: control target
= control target key end

     0   :  { %vm29_vm0 = vcmask 261120   ;;  %s483_s0 = inlined_call_operand.vmem [shape: f32[64,32], index: 0, kind: input, shape index: {}]   ;;  %s484_s3 = inlined_call_operand.vmem [shape: bf16[32,128], index: 3, kind: input, shape index: {}]   ;;  %s485_s1 = inlined_call_operand.vmem [shape: f32[1,32], index: 1, kind: input, shape index: {}]   ;;  %s486_s2 = inlined_call_operand.vmem [shape: f32[1,32], index: 2, kind: input, shape index: {}]   ;;  %s487_s4 = inlined_call_operand.vmem [shape: f32[1,128], index: 4, kind: input, shape index: {}]   ;;  %s488_s5 = inlined_call_operand.vmem [shape: f32[64,128], index: 5, kind: output, shape index: {}]  }
   0x1   :  { %v21_v0 = vld [vmem:[%s483_s0] sm:$0xff]  ;;  %v22_v2 = vld [vmem:[%s483_s0 + $0x8] sm:$0xff]  ;;  %v23_v8 = vld [vmem:[%s483_s0 + $0x10] sm:$0xff] }
   0x2   :  { %v25_v1 = vld [vmem:[%s483_s0 + $0x20] sm:$0xff]  ;;  %v30_v3 = vsel %vm29_vm0, %v21_v0, 0.0  ;;  %v26_v5 = vld [vmem:[%s483_s0 + $0x28] sm:$0xff]  ;;  %v33_v6 = vsel %vm29_vm0, %v22_v2, 0.0  ;;  %v24_v9 = vld [vmem:[%s483_s0 + $0x18] sm:$0xff]  ;;  %v36_v10 = vsel %vm29_vm0, %v23_v8, 0.0 }
   0x3   :  { %v42_v4 = vsel %vm29_vm0, %v25_v1, 0.0  ;;  %31 = vadd.xlane.f32.xlu0 %v30_v3  ;;  %v45_v7 = vsel %vm29_vm0, %v26_v5, 0.0  ;;  %v39_v11 = vsel %vm29_vm0, %v24_v9, 0.0  ;;  %v27_v12 = vld [vmem:[%s483_s0 + $0x30] sm:$0xff]  ;;  %v28_v13 = vld [vmem:[%s483_s0 + $0x38] sm:$0xff]  ;;  %v312_v56 = vld [vmem:[%s484_s3] sm:$0xff]  }
   0x4   :  { %43 = vadd.xlane.f32.xlu1 %v42_v4  ;;  %v48_v14 = vsel %vm29_vm0, %v27_v12, 0.0  ;;  %v51_v15 = vsel %vm29_vm0, %v28_v13, 0.0  ;;  %296 = vmatprep.subr.bf16.mxu0 %v312_v56  ;;  %v313_v57 = vld [vmem:[%s484_s3 + $0x8] sm:$0xff]  }
   0x5   :  { %308 = vmatprep.subr.bf16.mxu1 %v312_v56  ;;  %297 = vmatpush3.bf16.msra.mxu0 %v312_v56 }
   0x6   :  { %310 = vmatpush3.bf16.msra.mxu1 %v312_v56  ;;  %298 = vmatprep.subr.bf16.mxu0 %v313_v57 }
   0x7   :  { %34 = vadd.xlane.f32.xlu0 %v33_v6  ;;  %309 = vmatprep.subr.bf16.mxu1 %v313_v57 }
   0x8   :  { %46 = vadd.xlane.f32.xlu1 %v45_v7 }
   0x9   :  { %299 = vmatpush3.bf16.msra.mxu0 %v313_v57 }
   0xa   :  { %311 = vmatpush3.bf16.msra.mxu1 %v313_v57 }
   0xb   :  { %37 = vadd.xlane.f32.xlu0 %v36_v10 }
   0xc   :  { %40 = vadd.xlane.f32.xlu1 %v39_v11 }
   0xf   :  { %49 = vadd.xlane.f32.xlu0 %v48_v14 }
  0x10   :  { %52 = vadd.xlane.f32.xlu1 %v51_v15 }
  0x90   :  { %v32_v16 = vpop.xlane.xlu0 %31 }
  0x91   :  { %v44_v17 = vpop.xlane.xlu1 %43  ;;  %v55_v18 = vmul.f32 0.03125, %v32_v16 }
  0x92   :  { %v59_v19 = vmul.f32 0.03125, %v44_v17 }
  0x93   :  { %v392_v20 = vsub.f32 %v21_v0, %v55_v18 }
  0x94   :  { %v394_v21 = vsub.f32 %v25_v1, %v59_v19  ;;  %v35_v22 = vpop.xlane.xlu0 %34  ;;  %v281_v19 = vld [vmem:[%s485_s1] ss:$0 sm:$0xff] }
  0x95   :  { %v47_v23 = vpop.xlane.xlu1 %46  ;;  %v56_v24 = vmul.f32 0.03125, %v35_v22  ;;  %v71_v26 = vmul.f32 %v392_v20, %v392_v20 }
  0x96   :  { %v60_v25 = vmul.f32 0.03125, %v47_v23  ;;  %v75_v27 = vmul.f32 %v394_v21, %v394_v21 }
  0x97   :  { %v400_v28 = vsub.f32 %v22_v2, %v56_v24  ;;  %v79_v30 = vsel %vm29_vm0, %v71_v26, 0.0 }
  0x98   :  { %v402_v29 = vsub.f32 %v26_v5, %v60_v25  ;;  %80 = vadd.xlane.f32.xlu0 %v79_v30  ;;  %v38_v31 = vpop.xlane.xlu0 %37  ;;  %v91_v33 = vsel %vm29_vm0, %v75_v27, 0.0  ;;  %v282_v27 = vld [vmem:[%s486_s2] ss:$0 sm:$0xff] }
  0x99   :  { %v41_v32 = vpop.xlane.xlu1 %40  ;;  %v57_v34 = vmul.f32 0.03125, %v38_v31  ;;  %v72_v36 = vmul.f32 %v400_v28, %v400_v28 }
  0x9a   :  { %v58_v35 = vmul.f32 0.03125, %v41_v32  ;;  %v76_v37 = vmul.f32 %v402_v29, %v402_v29 }
  0x9b   :  { %v410_v38 = vsub.f32 %v23_v8, %v57_v34  ;;  %v82_v40 = vsel %vm29_vm0, %v72_v36, 0.0 }
  0x9c   :  { %v412_v39 = vsub.f32 %v24_v9, %v58_v35  ;;  %92 = vadd.xlane.f32.xlu0 %v91_v33  ;;  %83 = vadd.xlane.f32.xlu1 %v82_v40  ;;  %v50_v41 = vpop.xlane.xlu0 %49  ;;  %v94_v43 = vsel %vm29_vm0, %v76_v37, 0.0 }
  0x9d   :  { %v53_v42 = vpop.xlane.xlu1 %52  ;;  %v61_v44 = vmul.f32 0.03125, %v50_v41  ;;  %v73_v46 = vmul.f32 %v410_v38, %v410_v38 }
  0x9e   :  { %v62_v45 = vmul.f32 0.03125, %v53_v42  ;;  %v74_v47 = vmul.f32 %v412_v39, %v412_v39 }
  0x9f   :  { %v420_v48 = vsub.f32 %v27_v12, %v61_v44  ;;  %v85_v50 = vsel %vm29_vm0, %v73_v46, 0.0 }
  0xa0   :  { %v422_v49 = vsub.f32 %v28_v13, %v62_v45  ;;  %95 = vadd.xlane.f32.xlu1 %v94_v43  ;;  %86 = vadd.xlane.f32.xlu0 %v85_v50  ;;  %v88_v51 = vsel %vm29_vm0, %v74_v47, 0.0 }
  0xa1   :  { %v77_v52 = vmul.f32 %v420_v48, %v420_v48 }
  0xa2   :  { %v78_v53 = vmul.f32 %v422_v49, %v422_v49 }
  0xa3   :  { %v97_v54 = vsel %vm29_vm0, %v77_v52, 0.0 }
  0xa4   :  { %89 = vadd.xlane.f32.xlu1 %v88_v51  ;;  %98 = vadd.xlane.f32.xlu0 %v97_v54  ;;  %v100_v55 = vsel %vm29_vm0, %v78_v53, 0.0 }
  0xa8   :  { %101 = vadd.xlane.f32.xlu1 %v100_v55 }
 0x125   :  { %v81_v58 = vpop.xlane.xlu0 %80 }
 0x126   :  { %v103_v59 = vmul.f32 0.03125, %v81_v58 }
 0x128   :  { %v111_v60 = vadd.f32 1e-05, %v103_v59 }
 0x129   :  { %v84_v61 = vpop.xlane.xlu1 %83  ;;  %v93_v62 = vpop.xlane.xlu0 %92 }
 0x12a   :  { %314 = vrsqrt.f32 %v111_v60  ;;  %v104_v63 = vmul.f32 0.03125, %v84_v61  ;;  %v107_v0 = vmul.f32 0.03125, %v93_v62 }
 0x12c   :  { %v112_v1 = vadd.f32 1e-05, %v104_v63  ;;  %v115_v2 = vadd.f32 1e-05, %v107_v0 }
 0x12d   :  { %v96_v3 = vpop.xlane.xlu1 %95  ;;  %v87_v4 = vpop.xlane.xlu0 %86 }
 0x12e   :  { %316 = vrsqrt.f32 %v112_v1  ;;  %v108_v5 = vmul.f32 0.03125, %v96_v3  ;;  %v105_v6 = vmul.f32 0.03125, %v87_v4 }
 0x12f   :  { %318 = vrsqrt.f32 %v115_v2 }
 0x130   :  { %v116_v7 = vadd.f32 1e-05, %v108_v5  ;;  %v113_v8 = vadd.f32 1e-05, %v105_v6 }
 0x131   :  { %v90_v9 = vpop.xlane.xlu1 %89  ;;  %v99_v10 = vpop.xlane.xlu0 %98 }
 0x132   :  { %320 = vrsqrt.f32 %v116_v7  ;;  %v106_v11 = vmul.f32 0.03125, %v90_v9  ;;  %v109_v12 = vmul.f32 0.03125, %v99_v10 }
 0x133   :  { %322 = vrsqrt.f32 %v113_v8 }
 0x134   :  { %v315_v13 = vpop.eup %314  ;;  %v114_v14 = vadd.f32 1e-05, %v106_v11  ;;  %v117_v15 = vadd.f32 1e-05, %v109_v12 }
 0x135   :  { %v102_v16 = vpop.xlane.xlu1 %101  ;;  %v127_v17 = vmul.f32 %v315_v13, %v392_v20 }
 0x136   :  { %324 = vrsqrt.f32 %v114_v14  ;;  %v110_v18 = vmul.f32 0.03125, %v102_v16 }
 0x137   :  { %326 = vrsqrt.f32 %v117_v15  ;;  %v142_v26 = vmul.f32 %v281_v19, %v127_v17 }
 0x138   :  { %v317_v22 = vpop.eup %316  ;;  %v118_v23 = vadd.f32 1e-05, %v110_v18 }
 0x139   :  { %v319_v24 = vpop.eup %318  ;;  %v128_v25 = vmul.f32 %v317_v22, %v400_v28  ;;  %v157_v33 = vadd.f32 %v282_v27, %v142_v26 }
 0x13a   :  { %328 = vrsqrt.f32 %v118_v23  ;;  %v131_v20 = vmul.f32 %v319_v24, %v394_v21 }
 0x13b   :  { %v143_v30 = vmul.f32 %v281_v19, %v128_v25 }
 0x13c   :  { %v321_v31 = vpop.eup %320  ;;  %v146_v36 = vmul.f32 %v281_v19, %v131_v20 }
 0x13d   :  { %v323_v32 = vpop.eup %322  ;;  %v158_v34 = vadd.f32 %v282_v27, %v143_v30  ;;  %v132_v35 = vmul.f32 %v321_v31, %v402_v29 }
 0x13e   :  { %v129_v37 = vmul.f32 %v323_v32, %v410_v38  ;;  %v161_v44 = vadd.f32 %v282_v27, %v146_v36 }
 0x13f   :  { %v165_v40 = vpack.c.bf16 %v158_v34, %v157_v33  ;;  %v147_v28 = vmul.f32 %v281_v19, %v132_v35 }
 0x140   :  { %v325_v41 = vpop.eup %324  ;;  %v144_v45 = vmul.f32 %v281_v19, %v129_v37 }
 0x141   :  { %v327_v42 = vpop.eup %326  ;;  %v130_v43 = vmul.f32 %v325_v41, %v412_v39  ;;  %300 = vmatprep.mubr.msk.bf16.mxu0 %vm29_vm0, %v165_v40  ;;  %v162_v21 = vadd.f32 %v282_v27, %v147_v28 }
 0x142   :  { %v133_v46 = vmul.f32 %v327_v42, %v420_v48  ;;  %v159_v38 = vadd.f32 %v282_v27, %v144_v45  ;;  %v283_v48 = vld [vmem:[%s487_s4] ss:$0 sm:$0xff] }
 0x143   :  { %v167_v47 = vpack.c.bf16 %v162_v21, %v161_v44  ;;  %v145_v50 = vmul.f32 %v281_v19, %v130_v43 }
 0x144   :  { %v329_v51 = vpop.eup %328  ;;  %v148_v53 = vmul.f32 %v281_v19, %v133_v46 }
 0x145   :  { %v134_v29 = vmul.f32 %v329_v51, %v422_v49  ;;  %304 = vmatprep.mubr.msk.bf16.mxu1 %vm29_vm0, %v167_v47  ;;  %v160_v52 = vadd.f32 %v282_v27, %v145_v50 }
 0x146   :  { %v163_v39 = vadd.f32 %v282_v27, %v148_v53 }
 0x147   :  { %v166_v54 = vpack.c.bf16 %v160_v52, %v159_v38  ;;  %v149_v55 = vmul.f32 %v281_v19, %v134_v29 }
 0x149   :  { %301 = vmatmul.mubr.msk.bf16.vlgmr.msra.gmra.mrb[0].mxu0 %vm29_vm0, %v166_v54  ;;  %v164_v56 = vadd.f32 %v282_v27, %v149_v55 }
 0x14b   :  { %v168_v57 = vpack.c.bf16 %v164_v56, %v163_v39 }
 0x14d   :  { %305 = vmatmul.mubr.msk.bf16.vlgmr.msra.gmra.mrb[0].mxu1 %vm29_vm0, %v168_v57 }
 0x21c   :  { %v302_v58 = vpop.f32.mrb[0].mxu0 }
 0x21d   :  { %v247_v49 = vadd.f32 %v302_v58, %v283_v48  ;;  %v238_v59 = vpop.f32.mrb[1].mxu0 }
 0x21e   :  { %v239_v60 = vadd.f32 %v283_v48, %v238_v59  ;;  %v303_v61 = vpop.f32.mrb[2].mxu0 }
 0x21f   :  { %271 = vst [vmem:[%s488_s5 + $0x10] sm:$0xff] %v247_v49  ;;  %v250_v62 = vadd.f32 %v303_v61, %v283_v48  ;;  %v241_v63 = vpop.f32.mrb[3].mxu0 }
 0x220   :  { %269 = vst [vmem:[%s488_s5] sm:$0xff] %v239_v60  ;;  %v242_v0 = vadd.f32 %v283_v48, %v241_v63  ;;  %v306_v1 = vpop.f32.mrb[0].mxu1 }
 0x221   :  { %272 = vst [vmem:[%s488_s5 + $0x18] sm:$0xff] %v250_v62  ;;  %v263_v2 = vadd.f32 %v306_v1, %v283_v48  ;;  %v254_v3 = vpop.f32.mrb[1].mxu1 }
 0x222   :  { %270 = vst [vmem:[%s488_s5 + $0x8] sm:$0xff] %v242_v0  ;;  %v255_v4 = vadd.f32 %v283_v48, %v254_v3  ;;  %v307_v5 = vpop.f32.mrb[2].mxu1 }
 0x223   :  { %275 = vst [vmem:[%s488_s5 + $0x30] sm:$0xff] %v263_v2  ;;  %v266_v6 = vadd.f32 %v307_v5, %v283_v48  ;;  %v257_v7 = vpop.f32.mrb[3].mxu1 }
 0x224   :  { %273 = vst [vmem:[%s488_s5 + $0x20] sm:$0xff] %v255_v4  ;;  %v258_v8 = vadd.f32 %v283_v48, %v257_v7 }
 0x225   :  { %276 = vst [vmem:[%s488_s5 + $0x38] sm:$0xff] %v266_v6 }
 0x226   :  { %274 = vst [vmem:[%s488_s5 + $0x28] sm:$0xff] %v258_v8 }

</bundles_post_ra>
